<compile_context>
chip_gen: v7x
topology: tpu7x:2x2x1
jax: 0.10.0
libtpu: 0.0.40
codegen_flags: <defaults>
</compile_context>

<pallas_src>
import functools

import jax
import jax.numpy as jnp
from jax import lax
from jax.experimental import pallas as pl
from jax.experimental.pallas import tpu as pltpu

LN_EPS = 1e-5                     # torch.nn.LayerNorm default eps
MM_DTYPE = jnp.bfloat16           # MXU operand dtype (f32 accumulation everywhere)
LANE = 128

# VMEM budget adapts to the part: ~96 MiB on v5e/v6e (128 MiB physical),
# ~48 MiB on v7x (64 MiB physical).  Fallback is the v7x-safe value.
try:
    _VMEM_CAP = pltpu.get_tpu_info().vmem_capacity_bytes
except Exception:  # conservative fallback
    _VMEM_CAP = 64 * 1024 * 1024
VMEM_LIMIT = min((_VMEM_CAP * 3) // 4, 100 * 1024 * 1024)


def _round_up(x, m):
    return (x + m - 1) // m * m


def _zero_pad(a, shape):
    return jnp.pad(a, [(0, t - s) for s, t in zip(a.shape, shape)])


def _const_spec(block_shape, index_map):
    """Grid-invariant block: single-buffer it (halves its VMEM footprint)."""
    try:
        return pl.BlockSpec(block_shape, index_map, pipeline_mode=pl.Buffered(1))
    except TypeError:  # older jax without pipeline_mode support
        return pl.BlockSpec(block_shape, index_map)


def _layernorm(x, gamma, beta):
    mean = jnp.mean(x, axis=-1, keepdims=True)
    var = jnp.mean((x - mean) ** 2, axis=-1, keepdims=True)
    return (x - mean) * lax.rsqrt(var + LN_EPS) * gamma + beta


def _layernorm_padded(x, gamma, beta, true_dim):
    """LayerNorm over the first `true_dim` columns of a zero-padded x.

    x / gamma / beta are zero in columns [true_dim:]; statistics are computed
    over the true feature dim only and the padded columns stay exactly zero.
    """
    pad_dim = x.shape[-1]
    s = jnp.sum(x, axis=-1, keepdims=True)
    mean = s / true_dim
    ssq = jnp.sum((x - mean) ** 2, axis=-1, keepdims=True)
    ssq = ssq - (pad_dim - true_dim) * mean * mean  # drop padded-column deviations
    var = ssq / true_dim
    return (x - mean) * lax.rsqrt(var + LN_EPS) * gamma + beta


# ---------------------------------------------------------------------------
# Kernel 1a: nv = LayerNorm(embed), computed ONCE (hoisted out of the per-tile
# adjacency kernel), emitted in bf16 for the MXU similarity matmul.
# ---------------------------------------------------------------------------
def embed_ln_kernel(e_ref, g_ref, b_ref, nv_ref):
    nv_ref[...] = _layernorm(e_ref[...], g_ref[...], b_ref[...]).astype(nv_ref.dtype)


def embed_layernorm(embed, gamma, beta, *, row_tile=1024):
    n, e = embed.shape
    t = min(row_tile, n)
    return pl.pallas_call(
        embed_ln_kernel,
        grid=(pl.cdiv(n, t),),
        in_specs=[pl.BlockSpec((t, e), lambda i: (i, 0)),
                  _const_spec((1, e), lambda i: (0, 0)),
                  _const_spec((1, e), lambda i: (0, 0))],
        out_specs=pl.BlockSpec((t, e), lambda i: (i, 0)),
        out_shape=jax.ShapeDtypeStruct((n, e), MM_DTYPE),
        compiler_params=pltpu.CompilerParams(
            dimension_semantics=("parallel",), vmem_limit_bytes=VMEM_LIMIT),
    )(embed, gamma.reshape(1, e), beta.reshape(1, e))


# ---------------------------------------------------------------------------
# Kernel 1b: graph constructor  adj = softmax(relu(nv @ nv^T)), row-tiled.
#   nv^T is transposed once in the wrapper -> conventional (TQ,E)@(E,N) MXU
#   contraction, bf16 operands, f32 accumulation, exact softmax division.
#   Emits the f32 spec output AND a bf16 copy for the downstream GCN stack.
# ---------------------------------------------------------------------------
def graph_kernel(rows_ref, nvt_ref, adj_ref, adjb_ref):
    s = jnp.dot(rows_ref[...], nvt_ref[...],
                preferred_element_type=jnp.float32)      # (TQ, N), bf16 MXU
    s = jnp.maximum(s, 0.0)
    m = jnp.max(s, axis=-1, keepdims=True)
    p = jnp.exp(s - m)
    inv = 1.0 / jnp.sum(p, axis=-1, keepdims=True)       # exact (spec output)
    adj = p * inv
    adj_ref[...] = adj
    adjb_ref[...] = adj.astype(adjb_ref.dtype)


def graph_construct(nv, nv_t, *, row_tile=512):
    n, e = nv.shape
    tq = min(row_tile, n)
    # Keep >= 2 row tiles when possible so both v7x TensorCores get work.
    if tq >= n and n > 16 and n % 32 == 0:
        tq = n // 2
    return pl.pallas_call(
        graph_kernel,
        grid=(pl.cdiv(n, tq),),
        in_specs=[pl.BlockSpec((tq, e), lambda i: (i, 0)),
                  _const_spec((e, n), lambda i: (0, 0))],
        out_specs=(pl.BlockSpec((tq, n), lambda i: (i, 0)),
                   pl.BlockSpec((tq, n), lambda i: (i, 0))),
        out_shape=(jax.ShapeDtypeStruct((n, n), jnp.float32),
                   jax.ShapeDtypeStruct((n, n), MM_DTYPE)),
        compiler_params=pltpu.CompilerParams(
            dimension_semantics=("parallel",), vmem_limit_bytes=VMEM_LIMIT),
    )(nv, nv_t)


# ---------------------------------------------------------------------------
# Kernel 2: fused lin_start + `layers` GCN layers + residual add.
#   grid=(batch, layers); h and residual live in VMEM scratch across the layer
#   axis.  NOTE: the grid order (batch outer, layers inner) + ("parallel",
#   "arbitrary") is load-bearing for the scratch carry; do not reorder.
#   Hidden dim is zero-padded to 128 lanes; LN uses true-H statistics.
# ---------------------------------------------------------------------------
def gcn_stack_kernel(x_ref, adj_ref, ws_ref, bs_ref, wh_ref, bh_ref,
                     g_ref, bt_ref, o_ref, h_s, res_s, *, true_h):
    layer = pl.program_id(1)

    # Layer 0: lin_start + residual capture, kept VMEM-resident per batch.
    @pl.when(layer == 0)
    def _():
        h0 = jnp.dot(x_ref[0].astype(MM_DTYPE), ws_ref[...],
                     preferred_element_type=jnp.float32) + bs_ref[...]
        h_s[...] = h0
        res_s[...] = h0

    # One GCN layer:  h = LN(relu((A @ h) @ W + b))   (bf16 MXU, f32 acc/VPU)
    y = jnp.dot(adj_ref[...], h_s[...].astype(MM_DTYPE),
                preferred_element_type=jnp.float32)                 # (N, Hp)
    z = jnp.dot(y.astype(MM_DTYPE), wh_ref[0],
                preferred_element_type=jnp.float32) + bh_ref[0]     # (N, Hp)
    z = jnp.maximum(z, 0.0)
    h_s[...] = _layernorm_padded(z, g_ref[0], bt_ref[0], true_h)

    # Last layer: residual add -> single HBM write of the activation (bf16).
    @pl.when(layer == pl.num_programs(1) - 1)
    def _():
        o_ref[0] = (h_s[...] + res_s[...]).astype(o_ref.dtype)


def gcn_stack(x, adj_bf16, w_start, b_start, w_hidden, b_hidden,
              ln_gamma, ln_beta):
    bsz, n, din = x.shape
    layers, h, _ = w_hidden.shape
    hp = _round_up(h, LANE)

    ws = _zero_pad(w_start, (din, hp)).astype(MM_DTYPE)
    bs = _zero_pad(b_start.reshape(1, h), (1, hp))
    wh = _zero_pad(w_hidden, (layers, hp, hp)).astype(MM_DTYPE)
    bh = _zero_pad(b_hidden.reshape(layers, 1, h), (layers, 1, hp))
    g = _zero_pad(ln_gamma.reshape(layers, 1, h), (layers, 1, hp))
    bt = _zero_pad(ln_beta.reshape(layers, 1, h), (layers, 1, hp))

    kernel = functools.partial(gcn_stack_kernel, true_h=h)
    return pl.pallas_call(
        kernel,
        grid=(bsz, layers),
        in_specs=[
            pl.BlockSpec((1, n, din), lambda b, l: (b, 0, 0)),
            _const_spec((n, n), lambda b, l: (0, 0)),            # adj (bf16)
            _const_spec((din, hp), lambda b, l: (0, 0)),
            _const_spec((1, hp), lambda b, l: (0, 0)),
            pl.BlockSpec((1, hp, hp), lambda b, l: (l, 0, 0)),
            pl.BlockSpec((1, 1, hp), lambda b, l: (l, 0, 0)),
            pl.BlockSpec((1, 1, hp), lambda b, l: (l, 0, 0)),
            pl.BlockSpec((1, 1, hp), lambda b, l: (l, 0, 0)),
        ],
        out_specs=pl.BlockSpec((1, n, hp), lambda b, l: (b, 0, 0)),
        out_shape=jax.ShapeDtypeStruct((bsz, n, hp), MM_DTYPE),
        scratch_shapes=[pltpu.VMEM((n, hp), jnp.float32),    # h (layer carry)
                        pltpu.VMEM((n, hp), jnp.float32)],   # residual
        compiler_params=pltpu.CompilerParams(
            dimension_semantics=("parallel", "arbitrary"),
            vmem_limit_bytes=VMEM_LIMIT),
    )(x, adj_bf16, ws, bs, wh, bh, g, bt)


# ---------------------------------------------------------------------------
# Kernel 3: head.  pooled = (B, N*Hp) @ (N*Hp, Hp), K-TILED over the N*Hp
# contraction with an f32 VMEM accumulator; lin_end runs at the last K step.
# ---------------------------------------------------------------------------
def head_kernel(x_ref, wp_ref, w1_ref, b1_ref, w2_ref, b2_ref, o_ref, acc_ref):
    k = pl.program_id(0)

    @pl.when(k == 0)
    def _():
        acc_ref[...] = jnp.zeros_like(acc_ref)

    acc_ref[...] += jnp.dot(x_ref[...], wp_ref[...],
                            preferred_element_type=jnp.float32)

    @pl.when(k == pl.num_programs(0) - 1)
    def _():
        pooled = acc_ref[...]
        mid = jnp.maximum(
            jnp.dot(pooled.astype(MM_DTYPE), w1_ref[...],
                    preferred_element_type=jnp.float32) + b1_ref[...], 0.0)
        o_ref[...] = (jnp.dot(mid.astype(MM_DTYPE), w2_ref[...],
                              preferred_element_type=jnp.float32) + b2_ref[...])


def head(xres, w_pool, w1, b1, w2, b2, *, k_tile=4096):
    bsz, n, hp = xres.shape                       # xres already H-padded, bf16
    h = w_pool.shape[1]
    out_dim = w2.shape[1]
    outp = _round_up(out_dim, LANE)
    nhp = n * hp

    x_flat = xres.reshape(bsz, nhp)
    wp = _zero_pad(w_pool, (n, hp, hp)).astype(MM_DTYPE).reshape(nhp, hp)
    w1p = _zero_pad(w1, (hp, hp)).astype(MM_DTYPE)
    b1p = _zero_pad(b1.reshape(1, h), (1, hp))
    w2p = _zero_pad(w2, (hp, outp)).astype(MM_DTYPE)
    b2p = _zero_pad(b2.reshape(1, out_dim), (1, outp))

    tk = min(k_tile, nhp)
    out = pl.pallas_call(
        head_kernel,
        grid=(pl.cdiv(nhp, tk),),
        in_specs=[
            pl.BlockSpec((bsz, tk), lambda k: (0, k)),
            pl.BlockSpec((tk, hp), lambda k: (k, 0)),
            _const_spec((hp, hp), lambda k: (0, 0)),
            _const_spec((1, hp), lambda k: (0, 0)),
            _const_spec((hp, outp), lambda k: (0, 0)),
            _const_spec((1, outp), lambda k: (0, 0)),
        ],
        out_specs=pl.BlockSpec((bsz, outp), lambda k: (0, 0)),
        out_shape=jax.ShapeDtypeStruct((bsz, outp), jnp.float32),
        scratch_shapes=[pltpu.VMEM((bsz, hp), jnp.float32)],
        compiler_params=pltpu.CompilerParams(
            dimension_semantics=("arbitrary",),
            vmem_limit_bytes=VMEM_LIMIT),
    )(x_flat, wp, w1p, b1p, w2p, b2p)
    return out[:, :out_dim]


# ---------------------------------------------------------------------------
# Model wrapper
# ---------------------------------------------------------------------------
def init_params(key, in_dim, hidden, out_dim, layers, num_nodes, embed_dim):
    keys = jax.random.split(key, 8)
    p = {}
    p["embed"] = jax.random.normal(keys[0], (num_nodes, embed_dim), jnp.float32)
    p["gc_gamma"] = jnp.ones((embed_dim,), jnp.float32)
    p["gc_beta"] = jnp.zeros((embed_dim,), jnp.float32)
    p["w_start"] = jax.random.normal(keys[1], (in_dim, hidden), jnp.float32) * 0.1
    p["b_start"] = jnp.zeros((hidden,), jnp.float32)
    p["w_hidden"] = jax.random.normal(keys[2], (layers, hidden, hidden), jnp.float32) * 0.1
    p["b_hidden"] = jnp.zeros((layers, hidden), jnp.float32)
    p["ln_gamma"] = jnp.ones((layers, hidden), jnp.float32)
    p["ln_beta"] = jnp.zeros((layers, hidden), jnp.float32)
    p["w_pool"] = jax.random.normal(keys[3], (num_nodes, hidden, hidden), jnp.float32) * 0.1
    p["w_end1"] = jax.random.normal(keys[4], (hidden, hidden), jnp.float32) * 0.1
    p["b_end1"] = jnp.zeros((hidden,), jnp.float32)
    p["w_end2"] = jax.random.normal(keys[5], (hidden, out_dim), jnp.float32) * 0.1
    p["b_end2"] = jnp.zeros((out_dim,), jnp.float32)
    # note: self.alpha and the Dropout modules are never used in forward()
    return p


@functools.partial(jax.jit, static_argnames=("layers",))
def mymodel_forward(x, params, layers):
    del layers  # derived from parameter shapes

    # graph_constructor (the spec module): adj = softmax(relu(LN(E) @ LN(E)^T))
    nv = embed_layernorm(params["embed"], params["gc_gamma"], params["gc_beta"])
    nv_t = nv.T   # one-time XLA transpose -> conventional MXU contraction in-kernel
    adj, adj_b = graph_construct(nv, nv_t)

    # lin_start + all GCN layers + residual add, fused into ONE pallas_call.
    xres = gcn_stack(x, adj_b, params["w_start"], params["b_start"],
                     params["w_hidden"], params["b_hidden"],
                     params["ln_gamma"], params["ln_beta"])

    # K-tiled 'bnd,ndf->bf' pooling + lin_end; padding sliced off inside head().
    out = head(xres, params["w_pool"], params["w_end1"], params["b_end1"],
               params["w_end2"], params["b_end2"])
    return adj, out


# Pure-JAX f32/HIGHEST reference of the same math (sanity check).
def reference_forward(x, p, layers):
    def ln(v, g, b):
        mu = v.mean(-1, keepdims=True)
        var = ((v - mu) ** 2).mean(-1, keepdims=True)
        return (v - mu) / jnp.sqrt(var + LN_EPS) * g + b

    nv = ln(p["embed"], p["gc_gamma"], p["gc_beta"])
    adj = jax.nn.softmax(
        jax.nn.relu(jnp.dot(nv, nv.T, precision=lax.Precision.HIGHEST)), axis=-1)
    h = x @ p["w_start"] + p["b_start"]
    residual = h
    for i in range(layers):
        h = jnp.einsum("vw,nwd->nvd", adj, h)
        h = jax.nn.relu(h @ p["w_hidden"][i] + p["b_hidden"][i])
        h = ln(h, p["ln_gamma"][i], p["ln_beta"][i])
    h = residual + h
    pooled = jnp.einsum("bnd,ndf->bf", h, p["w_pool"])
    mid = jax.nn.relu(pooled @ p["w_end1"] + p["b_end1"])
    return adj, mid @ p["w_end2"] + p["b_end2"]


if __name__ == "__main__":
    batch, in_dim, hidden, out_dim = 2, 4, 32, 4
    layers, num_nodes, embed_dim = 2, 8, 16

    key = jax.random.PRNGKey(0)
    kx, kp = jax.random.split(key)
    x = jax.random.normal(kx, (batch, num_nodes, in_dim), jnp.float32)
    params = init_params(kp, in_dim, hidden, out_dim, layers, num_nodes, embed_dim)

    adj, out = jax.block_until_ready(mymodel_forward(x, params, layers))
    adj_ref, out_ref = reference_forward(x, params, layers)

    assert adj.shape == (num_nodes, num_nodes)
    assert out.shape == (batch, out_dim)
    # adj path: bf16 MXU operands + f32 accumulation + exact softmax division.
    # This is a deliberate precision trade-off vs. the f32/HIGHEST reference.
    assert jnp.allclose(adj, adj_ref, atol=2e-2, rtol=2e-2)
    # downstream GCN/head: bf16 MXU operands + bf16 xres (deliberate trade-off).
    assert jnp.allclose(out, out_ref, atol=5e-2, rtol=5e-2)

    print("KERNEL_OK")
</pallas_src>

<mosaic_0001>
module attributes {stable_mosaic.version = 11 : i64} {
  func.func @graph_kernel(%arg0: i32, %arg1: memref<8x16xbf16, #tpu.memory_space<vmem>>, %arg2: memref<16x8xbf16, #tpu.memory_space<vmem>>, %arg3: memref<8x8xf32, #tpu.memory_space<vmem>>, %arg4: memref<8x8xbf16, #tpu.memory_space<vmem>>) attributes {dimension_semantics = [#tpu.dimension_semantics<parallel>], iteration_bounds = array<i64: 1>, scalar_prefetch = 0 : i64, scratch_operands = 0 : i64, tpu.core_type = #tpu.core_type<tc>, window_params = [{transform_indices = @transform_0, window_bounds = array<i64: 8, 16>}, {pipeline_mode = #tpu.pipeline_mode<synchronous>, transform_indices = @transform_1, window_bounds = array<i64: 16, 8>}, {transform_indices = @transform_2, window_bounds = array<i64: 8, 8>}, {transform_indices = @transform_3, window_bounds = array<i64: 8, 8>}]} {
    %c0 = arith.constant 0 : index
    %c0_0 = arith.constant 0 : index
    %0 = vector.load %arg1[%c0, %c0_0] : memref<8x16xbf16, #tpu.memory_space<vmem>>, vector<8x16xbf16>
    %c0_1 = arith.constant 0 : index
    %c0_2 = arith.constant 0 : index
    %1 = vector.load %arg2[%c0_1, %c0_2] : memref<16x8xbf16, #tpu.memory_space<vmem>>, vector<16x8xbf16>
    %cst = arith.constant dense<0.000000e+00> : vector<8x8xf32>
    %2 = tpu.matmul %0, %1, %cst {dimension_numbers = #tpu.dot_dimension_numbers<[1], [0], [0], [1], [0, 0, 1, 1], [], []>} : vector<8x16xbf16>, vector<16x8xbf16>, vector<8x8xf32> -> vector<8x8xf32>
    %cst_3 = arith.constant 0.000000e+00 : f32
    %3 = vector.broadcast %cst_3 : f32 to vector<8x8xf32>
    %4 = arith.maximumf %2, %3 : vector<8x8xf32>
    %cst_4 = arith.constant dense<0xFF800000> : vector<8xf32>
    %5 = vector.multi_reduction <maximumf>, %4, %cst_4 [1] : vector<8x8xf32> to vector<8xf32>
    %6 = vector.shape_cast %5 : vector<8xf32> to vector<8x1xf32>
    %7 = vector.broadcast %6 : vector<8x1xf32> to vector<8x8xf32>
    %8 = arith.subf %4, %7 : vector<8x8xf32>
    %9 = math.exp %8 : vector<8x8xf32>
    %cst_5 = arith.constant dense<0.000000e+00> : vector<8xf32>
    %10 = vector.multi_reduction <add>, %9, %cst_5 [1] : vector<8x8xf32> to vector<8xf32>
    %11 = vector.shape_cast %10 : vector<8xf32> to vector<8x1xf32>
    %cst_6 = arith.constant 1.000000e+00 : f32
    %12 = vector.broadcast %cst_6 : f32 to vector<8x1xf32>
    %13 = arith.divf %12, %11 : vector<8x1xf32>
    %14 = vector.broadcast %13 : vector<8x1xf32> to vector<8x8xf32>
    %15 = arith.mulf %9, %14 : vector<8x8xf32>
    %c0_7 = arith.constant 0 : index
    %c0_8 = arith.constant 0 : index
    %16 = vector.load %arg3[%c0_7, %c0_8] : memref<8x8xf32, #tpu.memory_space<vmem>>, vector<8x8xf32>
    tpu.vector_store %arg3[%c0_7, %c0_8], %15 {strides = array<i32>} : memref<8x8xf32, #tpu.memory_space<vmem>>, vector<8x8xf32>,
    %17 = arith.truncf %15 : vector<8x8xf32> to vector<8x8xbf16>
    %c0_9 = arith.constant 0 : index
    %c0_10 = arith.constant 0 : index
    %18 = vector.load %arg4[%c0_9, %c0_10] : memref<8x8xbf16, #tpu.memory_space<vmem>>, vector<8x8xbf16>
    tpu.vector_store %arg4[%c0_9, %c0_10], %17 {strides = array<i32>} : memref<8x8xbf16, #tpu.memory_space<vmem>>, vector<8x8xbf16>,
    return
  }
  func.func @transform_0(%arg0: i32) -> (i32, i32) {
    %c0_i32 = arith.constant 0 : i32
    %c0_i32_0 = arith.constant 0 : i32
    return %arg0, %c0_i32 : i32, i32
  }
  func.func @transform_1(%arg0: i32) -> (i32, i32) {
    %c0_i32 = arith.constant 0 : i32
    %c0_i32_0 = arith.constant 0 : i32
    %c0_i32_1 = arith.constant 0 : i32
    return %c0_i32, %c0_i32_0 : i32, i32
  }
  func.func @transform_2(%arg0: i32) -> (i32, i32) {
    %c0_i32 = arith.constant 0 : i32
    %c0_i32_0 = arith.constant 0 : i32
    return %arg0, %c0_i32 : i32, i32
  }
  func.func @transform_3(%arg0: i32) -> (i32, i32) {
    %c0_i32 = arith.constant 0 : i32
    %c0_i32_0 = arith.constant 0 : i32
    return %arg0, %c0_i32 : i32, i32
  }
}

module attributes {stable_mosaic.version = 11 : i64} {
  func.func @embed_ln_kernel(%arg0: i32, %arg1: memref<8x16xf32, #tpu.memory_space<vmem>>, %arg2: memref<1x16xf32, #tpu.memory_space<vmem>>, %arg3: memref<1x16xf32, #tpu.memory_space<vmem>>, %arg4: memref<8x16xbf16, #tpu.memory_space<vmem>>) attributes {dimension_semantics = [#tpu.dimension_semantics<parallel>], iteration_bounds = array<i64: 1>, scalar_prefetch = 0 : i64, scratch_operands = 0 : i64, tpu.core_type = #tpu.core_type<tc>, window_params = [{transform_indices = @transform_0, window_bounds = array<i64: 8, 16>}, {pipeline_mode = #tpu.pipeline_mode<synchronous>, transform_indices = @transform_1, window_bounds = array<i64: 1, 16>}, {pipeline_mode = #tpu.pipeline_mode<synchronous>, transform_indices = @transform_2, window_bounds = array<i64: 1, 16>}, {transform_indices = @transform_3, window_bounds = array<i64: 8, 16>}]} {
    %c0 = arith.constant 0 : index
    %c0_0 = arith.constant 0 : index
    %0 = vector.load %arg1[%c0, %c0_0] : memref<8x16xf32, #tpu.memory_space<vmem>>, vector<8x16xf32>
    %c0_1 = arith.constant 0 : index
    %c0_2 = arith.constant 0 : index
    %1 = vector.load %arg2[%c0_1, %c0_2] : memref<1x16xf32, #tpu.memory_space<vmem>>, vector<1x16xf32>
    %c0_3 = arith.constant 0 : index
    %c0_4 = arith.constant 0 : index
    %2 = vector.load %arg3[%c0_3, %c0_4] : memref<1x16xf32, #tpu.memory_space<vmem>>, vector<1x16xf32>
    %cst = arith.constant dense<0.000000e+00> : vector<8xf32>
    %3 = vector.multi_reduction <add>, %0, %cst [1] : vector<8x16xf32> to vector<8xf32>
    %4 = vector.shape_cast %3 : vector<8xf32> to vector<8x1xf32>
    %cst_5 = arith.constant 1.600000e+01 : f32
    %5 = vector.broadcast %cst_5 : f32 to vector<8x1xf32>
    %6 = arith.divf %4, %5 : vector<8x1xf32>
    %7 = vector.broadcast %6 : vector<8x1xf32> to vector<8x16xf32>
    %8 = arith.subf %0, %7 : vector<8x16xf32>
    %9 = arith.mulf %8, %8 : vector<8x16xf32>
    %cst_6 = arith.constant dense<0.000000e+00> : vector<8xf32>
    %10 = vector.multi_reduction <add>, %9, %cst_6 [1] : vector<8x16xf32> to vector<8xf32>
    %11 = vector.shape_cast %10 : vector<8xf32> to vector<8x1xf32>
    %cst_7 = arith.constant 1.600000e+01 : f32
    %12 = vector.broadcast %cst_7 : f32 to vector<8x1xf32>
    %13 = arith.divf %11, %12 : vector<8x1xf32>
    %14 = vector.broadcast %6 : vector<8x1xf32> to vector<8x16xf32>
    %15 = arith.subf %0, %14 : vector<8x16xf32>
    %cst_8 = arith.constant 9.99999974E-6 : f32
    %16 = vector.broadcast %cst_8 : f32 to vector<8x1xf32>
    %17 = arith.addf %13, %16 : vector<8x1xf32>
    %18 = math.rsqrt %17 : vector<8x1xf32>
    %19 = vector.broadcast %18 : vector<8x1xf32> to vector<8x16xf32>
    %20 = arith.mulf %15, %19 : vector<8x16xf32>
    %21 = vector.broadcast %1 : vector<1x16xf32> to vector<8x16xf32>
    %22 = arith.mulf %20, %21 : vector<8x16xf32>
    %23 = vector.broadcast %2 : vector<1x16xf32> to vector<8x16xf32>
    %24 = arith.addf %22, %23 : vector<8x16xf32>
    %25 = arith.truncf %24 : vector<8x16xf32> to vector<8x16xbf16>
    %c0_9 = arith.constant 0 : index
    %c0_10 = arith.constant 0 : index
    %26 = vector.load %arg4[%c0_9, %c0_10] : memref<8x16xbf16, #tpu.memory_space<vmem>>, vector<8x16xbf16>
    tpu.vector_store %arg4[%c0_9, %c0_10], %25 {strides = array<i32>} : memref<8x16xbf16, #tpu.memory_space<vmem>>, vector<8x16xbf16>,
    return
  }
  func.func @transform_0(%arg0: i32) -> (i32, i32) {
    %c0_i32 = arith.constant 0 : i32
    %c0_i32_0 = arith.constant 0 : i32
    return %arg0, %c0_i32 : i32, i32
  }
  func.func @transform_1(%arg0: i32) -> (i32, i32) {
    %c0_i32 = arith.constant 0 : i32
    %c0_i32_0 = arith.constant 0 : i32
    %c0_i32_1 = arith.constant 0 : i32
    return %c0_i32, %c0_i32_0 : i32, i32
  }
  func.func @transform_2(%arg0: i32) -> (i32, i32) {
    %c0_i32 = arith.constant 0 : i32
    %c0_i32_0 = arith.constant 0 : i32
    %c0_i32_1 = arith.constant 0 : i32
    return %c0_i32, %c0_i32_0 : i32, i32
  }
  func.func @transform_3(%arg0: i32) -> (i32, i32) {
    %c0_i32 = arith.constant 0 : i32
    %c0_i32_0 = arith.constant 0 : i32
    return %arg0, %c0_i32 : i32, i32
  }
}

module attributes {stable_mosaic.version = 11 : i64} {
  func.func @gcn_stack_kernel(%arg0: i32, %arg1: i32, %arg2: memref<1x8x4xf32, #tpu.memory_space<vmem>>, %arg3: memref<8x8xbf16, #tpu.memory_space<vmem>>, %arg4: memref<4x128xbf16, #tpu.memory_space<vmem>>, %arg5: memref<1x128xf32, #tpu.memory_space<vmem>>, %arg6: memref<1x128x128xbf16, #tpu.memory_space<vmem>>, %arg7: memref<1x1x128xf32, #tpu.memory_space<vmem>>, %arg8: memref<1x1x128xf32, #tpu.memory_space<vmem>>, %arg9: memref<1x1x128xf32, #tpu.memory_space<vmem>>, %arg10: memref<1x8x128xbf16, #tpu.memory_space<vmem>>, %arg11: memref<8x128xf32, #tpu.memory_space<vmem>>, %arg12: memref<8x128xf32, #tpu.memory_space<vmem>>) attributes {dimension_semantics = [#tpu.dimension_semantics<parallel>, #tpu.dimension_semantics<arbitrary>], iteration_bounds = array<i64: 2, 2>, scalar_prefetch = 0 : i64, scratch_operands = 2 : i64, tpu.core_type = #tpu.core_type<tc>, window_params = [{transform_indices = @transform_0, window_bounds = array<i64: 1, 8, 4>}, {pipeline_mode = #tpu.pipeline_mode<synchronous>, transform_indices = @transform_1, window_bounds = array<i64: 8, 8>}, {pipeline_mode = #tpu.pipeline_mode<synchronous>, transform_indices = @transform_2, window_bounds = array<i64: 4, 128>}, {pipeline_mode = #tpu.pipeline_mode<synchronous>, transform_indices = @transform_3, window_bounds = array<i64: 1, 128>}, {transform_indices = @transform_4, window_bounds = array<i64: 1, 128, 128>}, {transform_indices = @transform_5, window_bounds = array<i64: 1, 1, 128>}, {transform_indices = @transform_6, window_bounds = array<i64: 1, 1, 128>}, {transform_indices = @transform_7, window_bounds = array<i64: 1, 1, 128>}, {transform_indices = @transform_8, window_bounds = array<i64: 1, 8, 128>}]} {
    %c0_i32 = arith.constant 0 : i32
    %0 = arith.cmpi eq, %arg1, %c0_i32 : i32
    %1 = arith.extui %0 : i1 to i32
    %c0_i32_0 = arith.constant 0 : i32
    %2 = arith.cmpi ne, %1, %c0_i32_0 : i32
    scf.if %2 {
      %c0_27 = arith.constant 0 : index
      %c0_28 = arith.constant 0 : index
      %c0_29 = arith.constant 0 : index
      %51 = vector.load %arg2[%c0_27, %c0_28, %c0_29] : memref<1x8x4xf32, #tpu.memory_space<vmem>>, vector<1x8x4xf32>
      %52 = vector.shape_cast %51 : vector<1x8x4xf32> to vector<8x4xf32>
      %53 = arith.truncf %52 : vector<8x4xf32> to vector<8x4xbf16>
      %c0_30 = arith.constant 0 : index
      %c0_31 = arith.constant 0 : index
      %54 = vector.load %arg4[%c0_30, %c0_31] : memref<4x128xbf16, #tpu.memory_space<vmem>>, vector<4x128xbf16>
      %cst_32 = arith.constant dense<0.000000e+00> : vector<8x128xf32>
      %55 = tpu.matmul %53, %54, %cst_32 {dimension_numbers = #tpu.dot_dimension_numbers<[1], [0], [0], [1], [0, 0, 1, 1], [], []>} : vector<8x4xbf16>, vector<4x128xbf16>, vector<8x128xf32> -> vector<8x128xf32>
      %c0_33 = arith.constant 0 : index
      %c0_34 = arith.constant 0 : index
      %56 = vector.load %arg5[%c0_33, %c0_34] : memref<1x128xf32, #tpu.memory_space<vmem>>, vector<1x128xf32>
      %57 = vector.broadcast %56 : vector<1x128xf32> to vector<8x128xf32>
      %58 = arith.addf %55, %57 : vector<8x128xf32>
      %c0_35 = arith.constant 0 : index
      %c0_36 = arith.constant 0 : index
      %59 = vector.load %arg11[%c0_35, %c0_36] : memref<8x128xf32, #tpu.memory_space<vmem>>, vector<8x128xf32>
      tpu.vector_store %arg11[%c0_35, %c0_36], %58 {strides = array<i32>} : memref<8x128xf32, #tpu.memory_space<vmem>>, vector<8x128xf32>,
      %c0_37 = arith.constant 0 : index
      %c0_38 = arith.constant 0 : index
      %60 = vector.load %arg12[%c0_37, %c0_38] : memref<8x128xf32, #tpu.memory_space<vmem>>, vector<8x128xf32>
      tpu.vector_store %arg12[%c0_37, %c0_38], %58 {strides = array<i32>} : memref<8x128xf32, #tpu.memory_space<vmem>>, vector<8x128xf32>,
    } else {
    }
    %c0 = arith.constant 0 : index
    %c0_1 = arith.constant 0 : index
    %3 = vector.load %arg3[%c0, %c0_1] : memref<8x8xbf16, #tpu.memory_space<vmem>>, vector<8x8xbf16>
    %c0_2 = arith.constant 0 : index
    %c0_3 = arith.constant 0 : index
    %4 = vector.load %arg11[%c0_2, %c0_3] : memref<8x128xf32, #tpu.memory_space<vmem>>, vector<8x128xf32>
    %5 = arith.truncf %4 : vector<8x128xf32> to vector<8x128xbf16>
    %cst = arith.constant dense<0.000000e+00> : vector<8x128xf32>
    %6 = tpu.matmul %3, %5, %cst {dimension_numbers = #tpu.dot_dimension_numbers<[1], [0], [0], [1], [0, 0, 1, 1], [], []>} : vector<8x8xbf16>, vector<8x128xbf16>, vector<8x128xf32> -> vector<8x128xf32>
    %7 = arith.truncf %6 : vector<8x128xf32> to vector<8x128xbf16>
    %c0_4 = arith.constant 0 : index
    %c0_5 = arith.constant 0 : index
    %c0_6 = arith.constant 0 : index
    %8 = vector.load %arg6[%c0_4, %c0_5, %c0_6] : memref<1x128x128xbf16, #tpu.memory_space<vmem>>, vector<1x128x128xbf16>
    %9 = vector.shape_cast %8 : vector<1x128x128xbf16> to vector<128x128xbf16>
    %cst_7 = arith.constant dense<0.000000e+00> : vector<8x128xf32>
    %10 = tpu.matmul %7, %9, %cst_7 {dimension_numbers = #tpu.dot_dimension_numbers<[1], [0], [0], [1], [0, 0, 1, 1], [], []>} : vector<8x128xbf16>, vector<128x128xbf16>, vector<8x128xf32> -> vector<8x128xf32>
    %c0_8 = arith.constant 0 : index
    %c0_9 = arith.constant 0 : index
    %c0_10 = arith.constant 0 : index
    %11 = vector.load %arg7[%c0_8, %c0_9, %c0_10] : memref<1x1x128xf32, #tpu.memory_space<vmem>>, vector<1x1x128xf32>
    %12 = vector.shape_cast %11 : vector<1x1x128xf32> to vector<1x128xf32>
    %13 = vector.broadcast %12 : vector<1x128xf32> to vector<8x128xf32>
    %14 = arith.addf %10, %13 : vector<8x128xf32>
    %cst_11 = arith.constant 0.000000e+00 : f32
    %15 = vector.broadcast %cst_11 : f32 to vector<8x128xf32>
    %16 = arith.maximumf %14, %15 : vector<8x128xf32>
    %c0_12 = arith.constant 0 : index
    %c0_13 = arith.constant 0 : index
    %c0_14 = arith.constant 0 : index
    %17 = vector.load %arg8[%c0_12, %c0_13, %c0_14] : memref<1x1x128xf32, #tpu.memory_space<vmem>>, vector<1x1x128xf32>
    %18 = vector.shape_cast %17 : vector<1x1x128xf32> to vector<1x128xf32>
    %c0_15 = arith.constant 0 : index
    %c0_16 = arith.constant 0 : index
    %c0_17 = arith.constant 0 : index
    %19 = vector.load %arg9[%c0_15, %c0_16, %c0_17] : memref<1x1x128xf32, #tpu.memory_space<vmem>>, vector<1x1x128xf32>
    %20 = vector.shape_cast %19 : vector<1x1x128xf32> to vector<1x128xf32>
    %cst_18 = arith.constant dense<0.000000e+00> : vector<8xf32>
    %21 = vector.multi_reduction <add>, %16, %cst_18 [1] : vector<8x128xf32> to vector<8xf32>
    %22 = vector.shape_cast %21 : vector<8xf32> to vector<8x1xf32>
    %cst_19 = arith.constant 3.200000e+01 : f32
    %23 = vector.broadcast %cst_19 : f32 to vector<8x1xf32>
    %24 = arith.divf %22, %23 : vector<8x1xf32>
    %25 = vector.broadcast %24 : vector<8x1xf32> to vector<8x128xf32>
    %26 = arith.subf %16, %25 : vector<8x128xf32>
    %27 = arith.mulf %26, %26 : vector<8x128xf32>
    %cst_20 = arith.constant dense<0.000000e+00> : vector<8xf32>
    %28 = vector.multi_reduction <add>, %27, %cst_20 [1] : vector<8x128xf32> to vector<8xf32>
    %29 = vector.shape_cast %28 : vector<8xf32> to vector<8x1xf32>
    %cst_21 = arith.constant 9.600000e+01 : f32
    %30 = vector.broadcast %cst_21 : f32 to vector<8x1xf32>
    %31 = arith.mulf %30, %24 : vector<8x1xf32>
    %32 = arith.mulf %31, %24 : vector<8x1xf32>
    %33 = arith.subf %29, %32 : vector<8x1xf32>
    %cst_22 = arith.constant 3.200000e+01 : f32
    %34 = vector.broadcast %cst_22 : f32 to vector<8x1xf32>
    %35 = arith.divf %33, %34 : vector<8x1xf32>
    %36 = vector.broadcast %24 : vector<8x1xf32> to vector<8x128xf32>
    %37 = arith.subf %16, %36 : vector<8x128xf32>
    %cst_23 = arith.constant 9.99999974E-6 : f32
    %38 = vector.broadcast %cst_23 : f32 to vector<8x1xf32>
    %39 = arith.addf %35, %38 : vector<8x1xf32>
    %40 = math.rsqrt %39 : vector<8x1xf32>
    %41 = vector.broadcast %40 : vector<8x1xf32> to vector<8x128xf32>
    %42 = arith.mulf %37, %41 : vector<8x128xf32>
    %43 = vector.broadcast %18 : vector<1x128xf32> to vector<8x128xf32>
    %44 = arith.mulf %42, %43 : vector<8x128xf32>
    %45 = vector.broadcast %20 : vector<1x128xf32> to vector<8x128xf32>
    %46 = arith.addf %44, %45 : vector<8x128xf32>
    %c0_24 = arith.constant 0 : index
    %c0_25 = arith.constant 0 : index
    %47 = vector.load %arg11[%c0_24, %c0_25] : memref<8x128xf32, #tpu.memory_space<vmem>>, vector<8x128xf32>
    tpu.vector_store %arg11[%c0_24, %c0_25], %46 {strides = array<i32>} : memref<8x128xf32, #tpu.memory_space<vmem>>, vector<8x128xf32>,
    %c1_i32 = arith.constant 1 : i32
    %48 = arith.cmpi eq, %arg1, %c1_i32 : i32
    %49 = arith.extui %48 : i1 to i32
    %c0_i32_26 = arith.constant 0 : i32
    %50 = arith.cmpi ne, %49, %c0_i32_26 : i32
    scf.if %50 {
      %c0_27 = arith.constant 0 : index
      %c0_28 = arith.constant 0 : index
      %51 = vector.load %arg11[%c0_27, %c0_28] : memref<8x128xf32, #tpu.memory_space<vmem>>, vector<8x128xf32>
      %c0_29 = arith.constant 0 : index
      %c0_30 = arith.constant 0 : index
      %52 = vector.load %arg12[%c0_29, %c0_30] : memref<8x128xf32, #tpu.memory_space<vmem>>, vector<8x128xf32>
      %53 = arith.addf %51, %52 : vector<8x128xf32>
      %54 = arith.truncf %53 : vector<8x128xf32> to vector<8x128xbf16>
      %c0_31 = arith.constant 0 : index
      %c0_32 = arith.constant 0 : index
      %c0_33 = arith.constant 0 : index
      %55 = vector.load %arg10[%c0_31, %c0_32, %c0_33] : memref<1x8x128xbf16, #tpu.memory_space<vmem>>, vector<1x8x128xbf16>
      %56 = vector.shape_cast %55 : vector<1x8x128xbf16> to vector<8x128xbf16>
      %57 = vector.shape_cast %54 : vector<8x128xbf16> to vector<1x8x128xbf16>
      tpu.vector_store %arg10[%c0_31, %c0_32, %c0_33], %57 {strides = array<i32>} : memref<1x8x128xbf16, #tpu.memory_space<vmem>>, vector<1x8x128xbf16>,
    } else {
    }
    return
  }
  func.func @transform_0(%arg0: i32, %arg1: i32) -> (i32, i32, i32) {
    %c0_i32 = arith.constant 0 : i32
    %c0_i32_0 = arith.constant 0 : i32
    %c0_i32_1 = arith.constant 0 : i32
    return %arg0, %c0_i32, %c0_i32_0 : i32, i32, i32
  }
  func.func @transform_1(%arg0: i32, %arg1: i32) -> (i32, i32) {
    %c0_i32 = arith.constant 0 : i32
    %c0_i32_0 = arith.constant 0 : i32
    %c0_i32_1 = arith.constant 0 : i32
    return %c0_i32, %c0_i32_0 : i32, i32
  }
  func.func @transform_2(%arg0: i32, %arg1: i32) -> (i32, i32) {
    %c0_i32 = arith.constant 0 : i32
    %c0_i32_0 = arith.constant 0 : i32
    %c0_i32_1 = arith.constant 0 : i32
    return %c0_i32, %c0_i32_0 : i32, i32
  }
  func.func @transform_3(%arg0: i32, %arg1: i32) -> (i32, i32) {
    %c0_i32 = arith.constant 0 : i32
    %c0_i32_0 = arith.constant 0 : i32
    %c0_i32_1 = arith.constant 0 : i32
    return %c0_i32, %c0_i32_0 : i32, i32
  }
  func.func @transform_4(%arg0: i32, %arg1: i32) -> (i32, i32, i32) {
    %c0_i32 = arith.constant 0 : i32
    %c0_i32_0 = arith.constant 0 : i32
    %c0_i32_1 = arith.constant 0 : i32
    return %arg1, %c0_i32, %c0_i32_0 : i32, i32, i32
  }
  func.func @transform_5(%arg0: i32, %arg1: i32) -> (i32, i32, i32) {
    %c0_i32 = arith.constant 0 : i32
    %c0_i32_0 = arith.constant 0 : i32
    %c0_i32_1 = arith.constant 0 : i32
    return %arg1, %c0_i32, %c0_i32_0 : i32, i32, i32
  }
  func.func @transform_6(%arg0: i32, %arg1: i32) -> (i32, i32, i32) {
    %c0_i32 = arith.constant 0 : i32
    %c0_i32_0 = arith.constant 0 : i32
    %c0_i32_1 = arith.constant 0 : i32
    return %arg1, %c0_i32, %c0_i32_0 : i32, i32, i32
  }
  func.func @transform_7(%arg0: i32, %arg1: i32) -> (i32, i32, i32) {
    %c0_i32 = arith.constant 0 : i32
    %c0_i32_0 = arith.constant 0 : i32
    %c0_i32_1 = arith.constant 0 : i32
    return %arg1, %c0_i32, %c0_i32_0 : i32, i32, i32
  }
  func.func @transform_8(%arg0: i32, %arg1: i32) -> (i32, i32, i32) {
    %c0_i32 = arith.constant 0 : i32
    %c0_i32_0 = arith.constant 0 : i32
    %c0_i32_1 = arith.constant 0 : i32
    return %arg0, %c0_i32, %c0_i32_0 : i32, i32, i32
  }
}

module attributes {stable_mosaic.version = 11 : i64} {
  func.func @head_kernel(%arg0: i32, %arg1: memref<2x1024xbf16, #tpu.memory_space<vmem>>, %arg2: memref<1024x128xbf16, #tpu.memory_space<vmem>>, %arg3: memref<128x128xbf16, #tpu.memory_space<vmem>>, %arg4: memref<1x128xf32, #tpu.memory_space<vmem>>, %arg5: memref<128x128xbf16, #tpu.memory_space<vmem>>, %arg6: memref<1x128xf32, #tpu.memory_space<vmem>>, %arg7: memref<2x128xf32, #tpu.memory_space<vmem>>, %arg8: memref<2x128xf32, #tpu.memory_space<vmem>>) attributes {dimension_semantics = [#tpu.dimension_semantics<arbitrary>], iteration_bounds = array<i64: 1>, scalar_prefetch = 0 : i64, scratch_operands = 1 : i64, tpu.core_type = #tpu.core_type<tc>, window_params = [{transform_indices = @transform_0, window_bounds = array<i64: 2, 1024>}, {transform_indices = @transform_1, window_bounds = array<i64: 1024, 128>}, {pipeline_mode = #tpu.pipeline_mode<synchronous>, transform_indices = @transform_2, window_bounds = array<i64: 128, 128>}, {pipeline_mode = #tpu.pipeline_mode<synchronous>, transform_indices = @transform_3, window_bounds = array<i64: 1, 128>}, {pipeline_mode = #tpu.pipeline_mode<synchronous>, transform_indices = @transform_4, window_bounds = array<i64: 128, 128>}, {pipeline_mode = #tpu.pipeline_mode<synchronous>, transform_indices = @transform_5, window_bounds = array<i64: 1, 128>}, {pipeline_mode = #tpu.pipeline_mode<synchronous>, transform_indices = @transform_6, window_bounds = array<i64: 2, 128>}]} {
    %c0_i32 = arith.constant 0 : i32
    %0 = arith.cmpi eq, %arg0, %c0_i32 : i32
    %1 = arith.extui %0 : i1 to i32
    %c0_i32_0 = arith.constant 0 : i32
    %2 = arith.cmpi ne, %1, %c0_i32_0 : i32
    scf.if %2 {
      %cst_10 = arith.constant 0.000000e+00 : f32
      %12 = vector.broadcast %cst_10 : f32 to vector<2x128xf32>
      %c0_11 = arith.constant 0 : index
      %c0_12 = arith.constant 0 : index
      %13 = vector.load %arg8[%c0_11, %c0_12] : memref<2x128xf32, #tpu.memory_space<vmem>>, vector<2x128xf32>
      tpu.vector_store %arg8[%c0_11, %c0_12], %12 {strides = array<i32>} : memref<2x128xf32, #tpu.memory_space<vmem>>, vector<2x128xf32>,
    } else {
    }
    %c0 = arith.constant 0 : index
    %c0_1 = arith.constant 0 : index
    %3 = vector.load %arg8[%c0, %c0_1] : memref<2x128xf32, #tpu.memory_space<vmem>>, vector<2x128xf32>
    %c0_2 = arith.constant 0 : index
    %c0_3 = arith.constant 0 : index
    %4 = vector.load %arg1[%c0_2, %c0_3] : memref<2x1024xbf16, #tpu.memory_space<vmem>>, vector<2x1024xbf16>
    %c0_4 = arith.constant 0 : index
    %c0_5 = arith.constant 0 : index
    %5 = vector.load %arg2[%c0_4, %c0_5] : memref<1024x128xbf16, #tpu.memory_space<vmem>>, vector<1024x128xbf16>
    %cst = arith.constant dense<0.000000e+00> : vector<2x128xf32>
    %6 = tpu.matmul %4, %5, %cst {dimension_numbers = #tpu.dot_dimension_numbers<[1], [0], [0], [1], [0, 0, 1, 1], [], []>} : vector<2x1024xbf16>, vector<1024x128xbf16>, vector<2x128xf32> -> vector<2x128xf32>
    %7 = arith.addf %3, %6 : vector<2x128xf32>
    %c0_6 = arith.constant 0 : index
    %c0_7 = arith.constant 0 : index
    %8 = vector.load %arg8[%c0_6, %c0_7] : memref<2x128xf32, #tpu.memory_space<vmem>>, vector<2x128xf32>
    tpu.vector_store %arg8[%c0_6, %c0_7], %7 {strides = array<i32>} : memref<2x128xf32, #tpu.memory_space<vmem>>, vector<2x128xf32>,
    %c0_i32_8 = arith.constant 0 : i32
    %9 = arith.cmpi eq, %arg0, %c0_i32_8 : i32
    %10 = arith.extui %9 : i1 to i32
    %c0_i32_9 = arith.constant 0 : i32
    %11 = arith.cmpi ne, %10, %c0_i32_9 : i32
    scf.if %11 {
      %c0_10 = arith.constant 0 : index
      %c0_11 = arith.constant 0 : index
      %12 = vector.load %arg8[%c0_10, %c0_11] : memref<2x128xf32, #tpu.memory_space<vmem>>, vector<2x128xf32>
      %13 = arith.truncf %12 : vector<2x128xf32> to vector<2x128xbf16>
      %c0_12 = arith.constant 0 : index
      %c0_13 = arith.constant 0 : index
      %14 = vector.load %arg3[%c0_12, %c0_13] : memref<128x128xbf16, #tpu.memory_space<vmem>>, vector<128x128xbf16>
      %cst_14 = arith.constant dense<0.000000e+00> : vector<2x128xf32>
      %15 = tpu.matmul %13, %14, %cst_14 {dimension_numbers = #tpu.dot_dimension_numbers<[1], [0], [0], [1], [0, 0, 1, 1], [], []>} : vector<2x128xbf16>, vector<128x128xbf16>, vector<2x128xf32> -> vector<2x128xf32>
      %c0_15 = arith.constant 0 : index
      %c0_16 = arith.constant 0 : index
      %16 = vector.load %arg4[%c0_15, %c0_16] : memref<1x128xf32, #tpu.memory_space<vmem>>, vector<1x128xf32>
      %17 = vector.broadcast %16 : vector<1x128xf32> to vector<2x128xf32>
      %18 = arith.addf %15, %17 : vector<2x128xf32>
      %cst_17 = arith.constant 0.000000e+00 : f32
      %19 = vector.broadcast %cst_17 : f32 to vector<2x128xf32>
      %20 = arith.maximumf %18, %19 : vector<2x128xf32>
      %21 = arith.truncf %20 : vector<2x128xf32> to vector<2x128xbf16>
      %c0_18 = arith.constant 0 : index
      %c0_19 = arith.constant 0 : index
      %22 = vector.load %arg5[%c0_18, %c0_19] : memref<128x128xbf16, #tpu.memory_space<vmem>>, vector<128x128xbf16>
      %cst_20 = arith.constant dense<0.000000e+00> : vector<2x128xf32>
      %23 = tpu.matmul %21, %22, %cst_20 {dimension_numbers = #tpu.dot_dimension_numbers<[1], [0], [0], [1], [0, 0, 1, 1], [], []>} : vector<2x128xbf16>, vector<128x128xbf16>, vector<2x128xf32> -> vector<2x128xf32>
      %c0_21 = arith.constant 0 : index
      %c0_22 = arith.constant 0 : index
      %24 = vector.load %arg6[%c0_21, %c0_22] : memref<1x128xf32, #tpu.memory_space<vmem>>, vector<1x128xf32>
      %25 = vector.broadcast %24 : vector<1x128xf32> to vector<2x128xf32>
      %26 = arith.addf %23, %25 : vector<2x128xf32>
      %c0_23 = arith.constant 0 : index
      %c0_24 = arith.constant 0 : index
      %27 = vector.load %arg7[%c0_23, %c0_24] : memref<2x128xf32, #tpu.memory_space<vmem>>, vector<2x128xf32>
      tpu.vector_store %arg7[%c0_23, %c0_24], %26 {strides = array<i32>} : memref<2x128xf32, #tpu.memory_space<vmem>>, vector<2x128xf32>,
    } else {
    }
    return
  }
  func.func @transform_0(%arg0: i32) -> (i32, i32) {
    %c0_i32 = arith.constant 0 : i32
    %c0_i32_0 = arith.constant 0 : i32
    return %c0_i32, %arg0 : i32, i32
  }
  func.func @transform_1(%arg0: i32) -> (i32, i32) {
    %c0_i32 = arith.constant 0 : i32
    %c0_i32_0 = arith.constant 0 : i32
    return %arg0, %c0_i32 : i32, i32
  }
  func.func @transform_2(%arg0: i32) -> (i32, i32) {
    %c0_i32 = arith.constant 0 : i32
    %c0_i32_0 = arith.constant 0 : i32
    %c0_i32_1 = arith.constant 0 : i32
    return %c0_i32, %c0_i32_0 : i32, i32
  }
  func.func @transform_3(%arg0: i32) -> (i32, i32) {
    %c0_i32 = arith.constant 0 : i32
    %c0_i32_0 = arith.constant 0 : i32
    %c0_i32_1 = arith.constant 0 : i32
    return %c0_i32, %c0_i32_0 : i32, i32
  }
  func.func @transform_4(%arg0: i32) -> (i32, i32) {
    %c0_i32 = arith.constant 0 : i32
    %c0_i32_0 = arith.constant 0 : i32
    %c0_i32_1 = arith.constant 0 : i32
    return %c0_i32, %c0_i32_0 : i32, i32
  }
  func.func @transform_5(%arg0: i32) -> (i32, i32) {
    %c0_i32 = arith.constant 0 : i32
    %c0_i32_0 = arith.constant 0 : i32
    %c0_i32_1 = arith.constant 0 : i32
    return %c0_i32, %c0_i32_0 : i32, i32
  }
  func.func @transform_6(%arg0: i32) -> (i32, i32) {
    %c0_i32 = arith.constant 0 : i32
    %c0_i32_0 = arith.constant 0 : i32
    %c0_i32_1 = arith.constant 0 : i32
    return %c0_i32, %c0_i32_0 : i32, i32
  }
}

</mosaic_0001>

<bundles_post_ra>
// kernel: mymodel_forward.4
= control target key start
LH: loop header
LB: loop body
LE: loop exit
PB: predicated region body
PF: predicated region fallthrough
CT: control target
= control target key end

     0   :  { %vm17_vm0 = vcmask 130048   ;;  %vm47_vm1 = vcmask 125952   ;;  %s89_s0 = inlined_call_operand.vmem [shape: f32[8,16], index: 0, kind: input, shape index: {}]   ;;  %s90_s1 = inlined_call_operand.vmem [shape: f32[1,16], index: 1, kind: input, shape index: {}]   ;;  %s91_s2 = inlined_call_operand.vmem [shape: f32[1,16], index: 2, kind: input, shape index: {}]   ;;  %s92_s3 = inlined_call_operand.vmem [shape: bf16[8,16], index: 3, kind: output, shape index: {}]  }
   0x1   :  { %v14_v0 = vld [vmem:[%s89_s0] sm:$0xff] }
   0x2   :  { %v18_v1 = vsel %vm17_vm0, %v14_v0, 0.0  ;;  %v53_v11 = vld [vmem:[%s90_s1] ss:$0 sm:$0xff] }
   0x3   :  { %19 = vadd.xlane.f32.xlu0 %v18_v1  ;;  %v54_v13 = vld [vmem:[%s91_s2] ss:$0 sm:$0xff] }
  0x90   :  { %v20_v2 = vpop.xlane.xlu0 %19 }
  0x91   :  { %v22_v3 = vmul.f32 0.0625, %v20_v2 }
  0x93   :  { %v23_v4 = vsub.f32 %v14_v0, %v22_v3 }
  0x95   :  { %v24_v5 = vmul.f32 %v23_v4, %v23_v4 }
  0x97   :  { %v25_v6 = vsel %vm17_vm0, %v24_v5, 0.0 }
  0x98   :  { %26 = vadd.xlane.f32.xlu0 %v25_v6 }
 0x125   :  { %v27_v7 = vpop.xlane.xlu0 %26 }
 0x126   :  { %v28_v8 = vmul.f32 0.0625, %v27_v7 }
 0x128   :  { %v29_v9 = vadd.f32 1e-05, %v28_v8 }
 0x12a   :  { %55 = vrsqrt.f32 %v29_v9 }
 0x134   :  { %v56_v10 = vpop.eup %55 }
 0x135   :  { %v31_v12 = vmul.f32 %v56_v10, %v23_v4 }
 0x137   :  { %v38_v14 = vmul.f32 %v53_v11, %v31_v12 }
 0x139   :  { %v45_v15 = vadd.f32 %v54_v13, %v38_v14 }
 0x13b   :  { %v46_v16 = vpack.c.bf16 %v45_v15, %v45_v15 }
 0x13d   :  { %48 = vst.msk [vmem:[%s92_s3] sm:$0xf] %vm47_vm1, %v46_v16 }

// kernel: mymodel_forward.5
= control target key start
LH: loop header
LB: loop body
LE: loop exit
PB: predicated region body
PF: predicated region fallthrough
CT: control target
= control target key end

     0   :  { %v146_v1 = vmov 0.0   ;;  %s194_s0 = inlined_call_operand.vmem [shape: bf16[8,16], index: 0, kind: input, shape index: {}]   ;;  %s195_s1 = inlined_call_operand.vmem [shape: bf16[16,8], index: 1, kind: input, shape index: {}]   ;;  %s196_s2 = inlined_call_operand.hbm [shape: f32[8,8], index: 2, kind: output, shape index: {0}]   ;;  %s197_s3 = inlined_call_operand.vmem [shape: bf16[8,8], index: 3, kind: output, shape index: {1}]  }
   0x1   :  { %v117_v0 = vld [vmem:[%s195_s1] sm:$0xff]   ;;  %108 = vmatprep.subr.bf16.mxu0 %v146_v1 }
   0x2   :  { %9 = vsyncpa [#allocation3], 0  ;;  %109 = vmatpush3.bf16.msra.mxu0 %v117_v0  ;;  %vm147_vm0 = vmmov 0   ;;  %v15_v2 = vld [vmem:[%s194_s0] sm:$0xf]  ;;  %vm24_vm1 = vcmask 130048  }
   0x3   :  { %110 = vmatprep.mubr.msk.bf16.mxu0 %vm147_vm0, %v146_v1  ;;  %vm69_vm2 = vcmask 64512   ;;  %s148_s0 = smov [#allocation2]   ;;  %vm84_vm3 = vcmask 60416  }
   0x4   :  { %s92_s1 = sshll.u32 %s148_s0, 4  ;;  %s93_s1 = int_to_ptr.vmem [resolvable:$true] %s92_s1 }
   0x5   :  { %111 = vmatmul.mubr.msk.bf16.vlgmr.msra.gmra.mrb[0].mxu0 %vm24_vm1, %v15_v2  ;;  %s122_s16 = scalar_lea.vmem %s93_s1, 128  ;;  %p127_p1 = scmp.lt.s32.totalorder %s93_s1, %s93_s1 }
   0x6   :  { %p123_p0 = scmp.ne.s32.totalorder %s93_s1, %s122_s16  ;;  %p128_p2 = scmp.lt.s32.totalorder %s122_s16, %s122_s16 }
   0x8   :  { %p129_p3 = por %p128_p2, %p127_p1 }
   0xa   :  { %p130_p4 = pnand %p129_p3, %p123_p0 }
  0xd8   :  { %v62_v3 = vpop.f32.mrb[0].mxu0 }
  0xd9   :  { %v68_v4 = vmax.f32 %v62_v3, 0.0  ;;  %v112_v5 = vpop.f32.mrb[1].mxu0 }
  0xda   :  { %v65_v6 = vpop.f32.mrb[2].mxu0 }
  0xdb   :  { %v113_v7 = vpop.f32.mrb[3].mxu0  ;;  %v70_v8 = vsel %vm69_vm2, %v68_v4, -inf }
  0xdc   :  { %71 = vmax.xlane.f32.xlu0 %v70_v8 }
 0x169   :  { %v72_v9 = vpop.xlane.xlu0 %71 }
 0x16a   :  { %v73_v10 = vsub.f32 %v68_v4, %v72_v9 }
 0x16c   :  { %v74_v11 = vmul.f32 1.442695, %v73_v10 }
 0x16e   :  { %118 = vpow2.f32 %v74_v11 }
 0x178   :  { %v119_v12 = vpop.eup %118 }
 0x179   :  { %v76_v13 = vsel %vm69_vm2, %v119_v12, 0.0 }
 0x17a   :  { %77 = vadd.xlane.f32.xlu0 %v76_v13 }
 0x207   :  { %v78_v14 = vpop.xlane.xlu0 %77 }
 0x208   :  { %120 = vrcp.f32 %v78_v14 }
 0x212   :  { %v121_v15 = vpop.eup %120 }
 0x213   :  { %v81_v16 = vmul.f32 %v121_v15, %v119_v12 }
 0x215   :  { %82 = vst.msk [vmem:[#allocation2] sm:$0xff] %vm69_vm2, %v81_v16  ;;  %v83_v17 = vpack.c.bf16 %v81_v16, %v81_v16 }
 0x216   :  { %133 = shalt.err (!%p130_p4)
}
 0x217   :  { %s134_s19 = scalar_lea.hbm %s196_s2, 128 }
 0x218   :  { %p135_p5 = scmp.ne.s32.totalorder %s196_s2, %s134_s19  ;;  %p138_p6 = scmp.lt.u32.totalorder %s134_s19, %s196_s2 }
 0x21a   :  { %p140_p7 = pnand %p138_p6, %p135_p5 }
 0x21c   :  { %143 = shalt.err (!%p140_p7)
}
 0x21d   :  { %95 = dma.vmem_to_hbm [thread:$0]  %s93_s1, 128, %s196_s2, [#allocation3]   ;;  %85 = vst.msk [vmem:[%s197_s3] sm:$0xf] %vm84_vm3, %v83_v17 }
 0x21e   :  { %144 = dma.done.wait [#allocation3], 128  }
 0x21f   :  { %145 = vsyncadd [#allocation3], 4294967168 }
 0x220   :  { %103 = vsyncpa [#allocation3], 1 }

// kernel: mymodel_forward.6
= control target key start
LH: loop header
LB: loop body
LE: loop exit
PB: predicated region body
PF: predicated region fallthrough
CT: control target
= control target key end

     0   :  { %s964_s27 = smov 0   ;;  %s966_s28 = smov 0   ;;  %s1076_s0 = inlined_call_operand.vmem [shape: f32[2,8,4], index: 0, kind: input, shape index: {}]   ;;  %s1077_s1 = inlined_call_operand.vmem [shape: bf16[8,8], index: 1, kind: input, shape index: {}]   ;;  %s1078_s2 = inlined_call_operand.vmem [shape: bf16[4,128], index: 2, kind: input, shape index: {}]   ;;  %s1079_s3 = inlined_call_operand.vmem [shape: f32[1,128], index: 3, kind: input, shape index: {}]   ;;  %s1080_s4 = inlined_call_operand.vmem [shape: bf16[2,128,128], index: 4, kind: input, shape index: {}]   ;;  %s1081_s5 = inlined_call_operand.vmem [shape: f32[2,1,128], index: 5, kind: input, shape index: {}]   ;;  %s1082_s6 = inlined_call_operand.vmem [shape: f32[2,1,128], index: 6, kind: input, shape index: {}]   ;;  %s1083_s7 = inlined_call_operand.vmem [shape: f32[2,1,128], index: 7, kind: input, shape index: {}]   ;;  %s1084_s8 = inlined_call_operand.vmem [shape: bf16[2,8,128], index: 8, kind: output, shape index: {}]  }
   0x1   :  { %s968_s29 = smov 0   ;;  %s970_s30 = smov 0  }
   0x2   :  { %s972_s9 = smov 0  }
   0x3 LB: > { %1086 = sst [smem:[#allocation4_spill]] %s909_s30  ;;  %s27_s10 = sadd.s32 1, %s905_s29  ;;  %s913_s9 = sphi %s972_s9, %s18_s9   ;;  %s909_s30 = sphi %s970_s30, %s1094_s30   ;;  %s905_s29 = sphi %s968_s29, %s1093_s29   ;;  %s901_s28 = sphi %s966_s28, %s1089_s28   ;;  %s897_s27 = sphi %s964_s27, %s1092_s27  }
   0x4   : > { %s30_s11 = sadd.s32 1, %s909_s30  ;;  %p28_p0 = scmp.ge.s32.totalorder %s27_s10, 2 }
   0x5   : > { %p752_p1 = scmp.ge.s32.totalorder %s913_s9, 1  ;;  %p307_p2 = scmp.lt.s32.totalorder %s913_s9, 5 }
   0x6   : > { %s1096_s10 = smov (%p28_p0, %s27_s10), 0  ;;  %s1098_s11 = smov (!%p28_p0, %s30_s11), %s909_s30 }
   0x7   : > { %1087 = sst [smem:[#allocation5_spill]] %s1096_s10  ;;  %p308_p3 = pnand %p752_p1, %p307_p2 }
   0x8   : > { %p32_p4 = scmp.ge.s32.totalorder %s1098_s11, 2  ;;  %p353_p5 = scmp.lt.s32.totalorder (!%p308_p3), %s901_s28, 1 }
   0x9   : > { %311 = sbr.rel (%p308_p3) target bundleno = 1007 (0x3ef), region = 52  ;;  %p357_p6 = scmp.lt.s32.totalorder (!%p308_p3), %s897_s27, 1 }
   0xa   : > { %s1100_s11 = smov (%p32_p4, %s1098_s11), 0  ;;  %p757_p7 = scmp.ne.s32.totalorder (!%p308_p3), %s897_s27, 0 }
   0xb   : > { %1088 = sst [smem:[#allocation6_spill]] %s1100_s11 }
  0x10   : > { %s1102_s28 = smov (!%p353_p5, %s901_s28), 1  ;;  %379 = sbr.rel (%p757_p7) target bundleno = 238 (0xee), region = 56 }
  0x11   : > { %s998_s12 = scalar_select %p357_p6, %s897_s27, 1 }
  0x12   : > { %s753_s13 = sshll.u32 %s1102_s28, 3  ;;  %s756_s14 = sshll.u32 %s1102_s28, 2  ;;  %v382_v0 = vld [vmem:[%s1078_s2] sm:$0x3] (!%p757_p7)  ;;  %vm394_vm0 = vcmask (!%p757_p7), 1041408   ;;  %v915_v2 = vmov (!%p757_p7), 0.0  }
  0x13   : > { %s356_s17 = scalar_lea.vmem %s1076_s0, %s753_s13  ;;  %s775_s18 = sshll.u32 %s998_s12, 6  ;;  %789 = vmatprep.subr.bf16.mxu0 (!%p757_p7), %v915_v2  ;;  %v396_v3 = vsel (!%p757_p7), %vm394_vm0, %v382_v0, 0  ;;  %vm916_vm1 = vmmov (!%p757_p7), 0   ;;  %vm390_vm2 = vcmask (!%p757_p7), 31744   ;;  %v758_v5 = vld [vmem:[%s1079_s3] ss:$0 sm:$0xff] (!%p757_p7) }
  0x14   : > { %s1007_s21 = scalar_lea.vmem %s1080_s4, %s775_s18  ;;  %s364_s24 = scalar_lea.vmem %s1081_s5, %s998_s12  ;;  %v380_v1 = vld [vmem:[%s356_s17] sm:$0xff] (!%p757_p7)  ;;  %791 = vmatprep.mubr.msk.bf16.mxu0 (!%p757_p7), %vm916_vm1, %v915_v2  ;;  %790 = vmatpush3.bf16.msra.mxu0 (!%p757_p7), %v396_v3 }
  0x15   : > { %s367_s11 = scalar_lea.vmem %s1082_s6, %s998_s12  ;;  %s370_s30 = scalar_lea.vmem %s1083_s7, %s998_s12  ;;  %v381_v4 = vpack.c.bf16 (!%p757_p7), %v380_v1, %v380_v1 }
  0x16   : > { %s1024_s16 = scalar_lea.vmem %s1084_s8, %s756_s14 }
  0x17   : > { %792 = vmatmul.mubr.msk.bf16.vlgmr.msra.gmra.mrb[0].mxu0 %vm390_vm2, %v381_v4 }
  0xea   : > { %v432_v6 = vpop.f32.mrb[0].mxu0 }
  0xeb   : > { %v433_v7 = vadd.f32 %v758_v5, %v432_v6  ;;  %v793_v8 = vpop.f32.mrb[1].mxu0 }
  0xec   : > { %v435_v9 = vpop.f32.mrb[2].mxu0 }
  0xed   : > { %438 = vst [vmem:[#allocation2] sm:$0xff] %v433_v7  ;;  %439 = vst [vmem:[#allocation3] sm:$0xff] %v433_v7  ;;  %v794_v10 = vpop.f32.mrb[3].mxu0 }
  0xee PF: > { %vm447_vm3 = vcmask 1043456   ;;  %v917_v12 = vmov 0.0   ;;  %vm918_vm4 = vmmov 0   ;;  %v865_v14 = vld [vmem:[%s1007_s21] sm:$0xff]   ;;  %v866_v17 = vld [vmem:[%s1007_s21 + $0x8] sm:$0xff]   ;;  %vm443_vm5 = vcmask 64512  }
  0xef   : > { %795 = vmatprep.subr.bf16.mxu0 %v917_v12  ;;  %797 = vmatprep.mubr.msk.bf16.mxu0 %vm918_vm4, %v917_v12  ;;  %v440_v15 = vld [vmem:[%s1077_s1] sm:$0xf]  ;;  %v867_v18 = vld [vmem:[%s1007_s21 + $0x10] sm:$0xff]   ;;  %v868_v19 = vld [vmem:[%s1007_s21 + $0x18] sm:$0xff]   ;;  %p772_p8 = scmp.ne.s32.totalorder %s897_s27, 1 }
  0xf0   : > { %801 = vmatprep.subr.bf16.mxu1 %v917_v12  ;;  %817 = vmatprep.mubr.msk.bf16.mxu1 %vm918_vm4, %v917_v12  ;;  %v869_v20 = vld [vmem:[%s1007_s21 + $0x20] sm:$0xff]   ;;  %v870_v21 = vld [vmem:[%s1007_s21 + $0x28] sm:$0xff]   ;;  %v871_v22 = vld [vmem:[%s1007_s21 + $0x30] sm:$0xff]  }
  0xf1   : > { %802 = vmatpush3.bf16.msra.mxu1 %v865_v14  ;;  %v872_v23 = vld [vmem:[%s1007_s21 + $0x38] sm:$0xff]   ;;  %v761_v29 = vld [vmem:[%s364_s24] ss:$0 sm:$0xff] }
  0xf2   : > { %803 = vmatprep.subr.bf16.mxu1 %v917_v12  ;;  %v770_v47 = vld [vmem:[%s367_s11] ss:$0 sm:$0xff] }
  0xf3   : > { %v771_v49 = vld [vmem:[%s370_s30] ss:$0 sm:$0xff] }
  0xf4   : > { %v441_v11 = vld [vmem:[#allocation2] sm:$0xff]  ;;  %v641_v53 = vld [vmem:[#allocation3] sm:$0xff] (!%p772_p8) }
  0xf5   : > { %v442_v13 = vpack.c.bf16 %v441_v11, %v441_v11  ;;  %804 = vmatpush3.bf16.msra.mxu1 %v866_v17 }
  0xf6   : > { %805 = vmatprep.subr.bf16.mxu1 %v917_v12 }
  0xf7   : > { %v449_v16 = vsel %vm447_vm3, %v442_v13, 0 }
  0xf8   : > { %796 = vmatpush3.bf16.msra.mxu0 %v449_v16 }
  0xf9   : > { %806 = vmatpush3.bf16.msra.mxu1 %v867_v18 }
  0xfa   : > { %807 = vmatprep.subr.bf16.mxu1 %v917_v12 }
  0xfb   : > { %798 = vmatmul.mubr.msk.bf16.vlgmr.msra.gmra.mrb[0].mxu0 %vm443_vm5, %v440_v15 }
  0xfd   : > { %808 = vmatpush3.bf16.msra.mxu1 %v868_v19 }
  0xfe   : > { %809 = vmatprep.subr.bf16.mxu1 %v917_v12 }
 0x101   : > { %810 = vmatpush3.bf16.msra.mxu1 %v869_v20 }
 0x102   : > { %811 = vmatprep.subr.bf16.mxu1 %v917_v12 }
 0x105   : > { %812 = vmatpush3.bf16.msra.mxu1 %v870_v21 }
 0x106   : > { %813 = vmatprep.subr.bf16.mxu1 %v917_v12 }
 0x109   : > { %814 = vmatpush3.bf16.msra.mxu1 %v871_v22 }
 0x10a   : > { %815 = vmatprep.subr.bf16.mxu1 %v917_v12 }
 0x10d   : > { %816 = vmatpush3.bf16.msra.mxu1 %v872_v23 }
 0x1ce   : > { %v485_v24 = vpop.f32.mrb[0].mxu0 }
 0x1cf   : > { %v491_v25 = vpack.c.bf16 %v485_v24, %v485_v24  ;;  %v799_v26 = vpop.f32.mrb[1].mxu0 }
 0x1d0   : > { %v488_v27 = vpop.f32.mrb[2].mxu0 }
 0x1d1   : > { %v800_v28 = vpop.f32.mrb[3].mxu0  ;;  %818 = vmatmul.mubr.bf16.vlgmr.msra.gmra.mrb[0].mxu1 %v491_v25 }
 0x2a4   : > { %v597_v30 = vpop.f32.mrb[0].mxu1 }
 0x2a5   : > { %v598_v31 = vadd.f32 %v761_v29, %v597_v30  ;;  %v819_v32 = vpop.f32.mrb[1].mxu1 }
 0x2a6   : > { %v600_v33 = vpop.f32.mrb[2].mxu1 }
 0x2a7   : > { %v603_v34 = vmax.f32 %v598_v31, 0.0  ;;  %v820_v35 = vpop.f32.mrb[3].mxu1 }
 0x2a9   : > { %606 = vadd.xlane.f32.xlu0 %v603_v34 }
 0x336   : > { %v607_v36 = vpop.xlane.xlu0 %606 }
 0x337   : > { %v609_v37 = vmul.f32 0.03125, %v607_v36 }
 0x339   : > { %v610_v38 = vsub.f32 %v603_v34, %v609_v37  ;;  %v614_v40 = vmul.f32 96.0, %v609_v37 }
 0x33b   : > { %v611_v39 = vmul.f32 %v610_v38, %v610_v38  ;;  %v615_v41 = vmul.f32 %v614_v40, %v609_v37 }
 0x33d   : > { %612 = vadd.xlane.f32.xlu0 %v611_v39 }
 0x3ca   : > { %v613_v42 = vpop.xlane.xlu0 %612 }
 0x3cb   : > { %v616_v43 = vsub.f32 %v613_v42, %v615_v41 }
 0x3cd   : > { %v617_v44 = vmul.f32 0.03125, %v616_v43 }
 0x3cf   : > { %v618_v45 = vadd.f32 1e-05, %v617_v44 }
 0x3d1   : > { %873 = vrsqrt.f32 %v618_v45 }
 0x3db   : > { %v874_v46 = vpop.eup %873 }
 0x3dc   : > { %v620_v48 = vmul.f32 %v874_v46, %v610_v38  ;;  %639 = sbr.rel (%p772_p8) target bundleno = 1007 (0x3ef), region = 60 }
 0x3de   : > { %v627_v50 = vmul.f32 %v770_v47, %v620_v48 }
 0x3e0   : > { %v634_v51 = vadd.f32 %v771_v49, %v627_v50 }
 0x3e2   : > { %635 = vst [vmem:[#allocation2] sm:$0xff] %v634_v51 }
 0x3e9   : > { %v640_v52 = vld [vmem:[#allocation2] sm:$0xff] }
 0x3ea   : > { %v642_v54 = vadd.f32 %v641_v53, %v640_v52 }
 0x3ec   : > { %v643_v55 = vpack.c.bf16 %v642_v54, %v642_v54 }
 0x3ee   : > { %644 = vst [vmem:[%s1024_s16] sm:$0xf] %v643_v55 }
 0x3ef PF: > { %s18_s9 = sadd.s32 1, %s913_s9   ;;  %s1089_s28 = sld [smem:[#allocation4_spill]] }
 0x3f0   : > { %p15_p9 = scmp.ge.s32.totalorder %s18_s9, 6   ;;  %s1090_s30 = sld [smem:[#allocation5_spill]] }
 0x3f1   : > { %s1091_s11 = sld [smem:[#allocation6_spill]]  ;;  %s1092_s27 = smov %s905_s29 }
 0x3f2   :  { %17 = sbr.rel (!%p15_p9) target bundleno = 3 (0x3), region = 102 }
 0x3f6   : > { %s1093_s29 = smov %s1090_s30 }
 0x3f7   : > { %s1094_s30 = smov %s1091_s11 }

// kernel: mymodel_forward.7
= control target key start
LH: loop header
LB: loop body
LE: loop exit
PB: predicated region body
PF: predicated region fallthrough
CT: control target
= control target key end

     0   :  { %v165_v28 = vlaneseq  ;;  %v1345_v36 = vmov 1966171168   ;;  %s1677_s0 = inlined_call_operand.vmem [shape: bf16[2,1024], index: 0, kind: input, shape index: {}]   ;;  %s1678_s1 = inlined_call_operand.vmem [shape: bf16[1024,128], index: 1, kind: input, shape index: {}]   ;;  %s1679_s2 = inlined_call_operand.vmem [shape: bf16[128,128], index: 2, kind: input, shape index: {}]   ;;  %s1680_s3 = inlined_call_operand.vmem [shape: f32[1,128], index: 3, kind: input, shape index: {}]   ;;  %s1681_s4 = inlined_call_operand.vmem [shape: bf16[128,128], index: 4, kind: input, shape index: {}]   ;;  %s1682_s5 = inlined_call_operand.vmem [shape: f32[1,128], index: 5, kind: input, shape index: {}]   ;;  %s1683_s6 = inlined_call_operand.hbm [shape: f32[2,128], index: 6, kind: output, shape index: {}]  }
   0x1   :  { %v1240_v0 = vld [vmem:[%s1678_s1 + $0x40] sm:$0xff]   ;;  %v1244_v4 = vld [vmem:[%s1678_s1 + $0x48] sm:$0xff]   ;;  %v1248_v8 = vld [vmem:[%s1678_s1 + $0x50] sm:$0xff]   ;;  %v163_v37 = vunpack.c.l.s4 %v1345_v36 }
   0x2   :  { %v1241_v1 = vld [vmem:[%s1678_s1 + $0xc0] sm:$0xff]   ;;  %1090 = vmatprep.subr.bf16.mxu0 %v1240_v0  ;;  %v1245_v5 = vld [vmem:[%s1678_s1 + $0xc8] sm:$0xff]   ;;  %v1249_v9 = vld [vmem:[%s1678_s1 + $0xd0] sm:$0xff]   ;;  %v166_v33 = vshrl.u32 %v165_v28, 7 }
   0x3   :  { %v1242_v2 = vld [vmem:[%s1678_s1] sm:$0xff]   ;;  %1112 = vmatprep.subr.bf16.mxu1 %v1241_v1  ;;  %v1246_v6 = vld [vmem:[%s1678_s1 + $0x8] sm:$0xff]   ;;  %v1250_v10 = vld [vmem:[%s1678_s1 + $0x10] sm:$0xff]   ;;  %v164_v40 = vunpack.c.0.s8 %v163_v37 }
   0x4   :  { %v1243_v3 = vld [vmem:[%s1678_s1 + $0x80] sm:$0xff]   ;;  %1091 = vmatpush3.bf16.msra.mxu0 %v1242_v2  ;;  %v1247_v7 = vld [vmem:[%s1678_s1 + $0x88] sm:$0xff]   ;;  %v1251_v11 = vld [vmem:[%s1678_s1 + $0x90] sm:$0xff]  }
   0x5   :  { %1113 = vmatpush3.bf16.msra.mxu1 %v1243_v3  ;;  %1092 = vmatprep.subr.bf16.mxu0 %v1244_v4  ;;  %v1252_v12 = vld [vmem:[%s1678_s1 + $0x58] sm:$0xff]   ;;  %v1256_v16 = vld [vmem:[%s1678_s1 + $0x60] sm:$0xff]   ;;  %v1260_v20 = vld [vmem:[%s1678_s1 + $0x68] sm:$0xff]   ;;  %v1489_v41 = vsub.s32 %v164_v40, %v166_v33 }
   0x6   :  { %1114 = vmatprep.subr.bf16.mxu1 %v1245_v5  ;;  %v1253_v13 = vld [vmem:[%s1678_s1 + $0xd8] sm:$0xff]   ;;  %v1257_v17 = vld [vmem:[%s1678_s1 + $0xe0] sm:$0xff]   ;;  %v1261_v21 = vld [vmem:[%s1678_s1 + $0xe8] sm:$0xff]  }
   0x7   :  { %v1254_v14 = vld [vmem:[%s1678_s1 + $0x18] sm:$0xff]   ;;  %v1258_v18 = vld [vmem:[%s1678_s1 + $0x20] sm:$0xff]   ;;  %v1262_v22 = vld [vmem:[%s1678_s1 + $0x28] sm:$0xff]  }
   0x8   :  { %1093 = vmatpush3.bf16.msra.mxu0 %v1246_v6  ;;  %v1255_v15 = vld [vmem:[%s1678_s1 + $0x98] sm:$0xff]   ;;  %v1259_v19 = vld [vmem:[%s1678_s1 + $0xa0] sm:$0xff]   ;;  %v1263_v23 = vld [vmem:[%s1678_s1 + $0xa8] sm:$0xff]  }
   0x9   :  { %1115 = vmatpush3.bf16.msra.mxu1 %v1247_v7  ;;  %1094 = vmatprep.subr.bf16.mxu0 %v1248_v8  ;;  %v1264_v24 = vld [vmem:[%s1678_s1 + $0x70] sm:$0xff]   ;;  %v1268_v29 = vld [vmem:[%s1678_s1 + $0x78] sm:$0xff]   ;;  %v31_v34 = vld [vmem:[%s1677_s0] sm:$0xff] }
   0xa   :  { %1116 = vmatprep.subr.bf16.mxu1 %v1249_v9  ;;  %v1265_v25 = vld [vmem:[%s1678_s1 + $0xf0] sm:$0xff]   ;;  %v1269_v30 = vld [vmem:[%s1678_s1 + $0xf8] sm:$0xff]   ;;  %v1273_v35 = vld [vmem:[%s1678_s1 + $0x140] sm:$0xff]   ;;  %v161_v39 = vcombine.high %v31_v34, %v31_v34  ;;  %v168_v42 = vrot.slane %v31_v34, %v1489_v41 }
   0xb   :  { %v1266_v26 = vld [vmem:[%s1678_s1 + $0x30] sm:$0xff]   ;;  %v1270_v31 = vld [vmem:[%s1678_s1 + $0x38] sm:$0xff]   ;;  %v1274_v38 = vld [vmem:[%s1678_s1 + $0x1c0] sm:$0xff]  }
   0xc   :  { %1095 = vmatpush3.bf16.msra.mxu0 %v1250_v10  ;;  %v1267_v27 = vld [vmem:[%s1678_s1 + $0xb0] sm:$0xff]   ;;  %v1271_v32 = vld [vmem:[%s1678_s1 + $0xb8] sm:$0xff]   ;;  %v1493_v43 = vrot.slane %v161_v39, %v1489_v41  ;;  %v176_v44 = vcombine.high %v168_v42, %v168_v42  ;;  %v184_v45 = vrot.slane %v168_v42, %v1489_v41  ;;  %v1275_v47 = vld [vmem:[%s1678_s1 + $0x100] sm:$0xff]  }
   0xd   :  { %1117 = vmatpush3.bf16.msra.mxu1 %v1251_v11  ;;  %1096 = vmatprep.subr.bf16.mxu0 %v1252_v12  ;;  %v1276_v49 = vld [vmem:[%s1678_s1 + $0x180] sm:$0xff]   ;;  %v1277_v52 = vld [vmem:[%s1678_s1 + $0x148] sm:$0xff]   ;;  %v1281_v58 = vld [vmem:[%s1678_s1 + $0x150] sm:$0xff]  }
   0xe   :  { %1118 = vmatprep.subr.bf16.mxu1 %v1253_v13  ;;  %v177_v46 = vcombine.high %v1493_v43, %v1493_v43  ;;  %v198_v48 = vrot.slane %v176_v44, %v1489_v41  ;;  %v206_v51 = vcombine.high %v184_v45, %v184_v45  ;;  %v1278_v54 = vld [vmem:[%s1678_s1 + $0x1c8] sm:$0xff]   ;;  %v1282_v59 = vld [vmem:[%s1678_s1 + $0x1d0] sm:$0xff]   ;;  %v1285_v62 = vld [vmem:[%s1678_s1 + $0x158] sm:$0xff]  }
   0xf   :  { %v1279_v55 = vld [vmem:[%s1678_s1 + $0x108] sm:$0xff]   ;;  %v1283_v60 = vld [vmem:[%s1678_s1 + $0x110] sm:$0xff]   ;;  %v1286_v63 = vld [vmem:[%s1678_s1 + $0x1d8] sm:$0xff]  }
  0x10   :  { %1097 = vmatpush3.bf16.msra.mxu0 %v1254_v14  ;;  %v205_v50 = vrot.slane %v177_v46, %v1489_v41  ;;  %634 = vmatprep.mubr.bf16.mxu0 %v198_v48  ;;  %v208_v53 = vcombine.high %v198_v48, %v198_v48  ;;  %v1280_v57 = vld [vmem:[%s1678_s1 + $0x188] sm:$0xff]   ;;  %v1284_v61 = vld [vmem:[%s1678_s1 + $0x190] sm:$0xff]   ;;  %v1287_v0 = vld [vmem:[%s1678_s1 + $0x118] sm:$0xff]  }
  0x11   :  { %1119 = vmatpush3.bf16.msra.mxu1 %v1255_v15  ;;  %1098 = vmatprep.subr.bf16.mxu0 %v1256_v16  ;;  %v1288_v1 = vld [vmem:[%s1678_s1 + $0x198] sm:$0xff]   ;;  %v1289_v2 = vld [vmem:[%s1678_s1 + $0x160] sm:$0xff]   ;;  %v1293_v6 = vld [vmem:[%s1678_s1 + $0x168] sm:$0xff]  }
  0x12   :  { %1120 = vmatprep.subr.bf16.mxu1 %v1257_v17  ;;  %v209_v56 = vcombine.high %v205_v50, %v205_v50  ;;  %674 = vmatprep.mubr.bf16.mxu1 %v208_v53  ;;  %v1290_v3 = vld [vmem:[%s1678_s1 + $0x1e0] sm:$0xff]   ;;  %v1294_v7 = vld [vmem:[%s1678_s1 + $0x1e8] sm:$0xff]   ;;  %v1297_v10 = vld [vmem:[%s1678_s1 + $0x170] sm:$0xff]  }
  0x13   :  { %v1291_v4 = vld [vmem:[%s1678_s1 + $0x120] sm:$0xff]   ;;  %v1295_v8 = vld [vmem:[%s1678_s1 + $0x128] sm:$0xff]   ;;  %v1298_v11 = vld [vmem:[%s1678_s1 + $0x1f0] sm:$0xff]  }
  0x14   :  { %1099 = vmatpush3.bf16.msra.mxu0 %v1258_v18  ;;  %v1292_v5 = vld [vmem:[%s1678_s1 + $0x1a0] sm:$0xff]   ;;  %v1296_v9 = vld [vmem:[%s1678_s1 + $0x1a8] sm:$0xff]   ;;  %v1299_v12 = vld [vmem:[%s1678_s1 + $0x130] sm:$0xff]   ;;  %v191_v18 = vrot.slane %v1493_v43, %v1489_v41 }
  0x15   :  { %1121 = vmatpush3.bf16.msra.mxu1 %v1259_v19  ;;  %1100 = vmatprep.subr.bf16.mxu0 %v1260_v20  ;;  %v1301_v13 = vld [vmem:[%s1678_s1 + $0x178] sm:$0xff]   ;;  %v1300_v14 = vld [vmem:[%s1678_s1 + $0x1b0] sm:$0xff]  }
  0x16   :  { %1122 = vmatprep.subr.bf16.mxu1 %v1261_v21  ;;  %v1302_v15 = vld [vmem:[%s1678_s1 + $0x1f8] sm:$0xff]  }
  0x17   :  { %v1303_v16 = vld [vmem:[%s1678_s1 + $0x138] sm:$0xff]  }
  0x18   :  { %1101 = vmatpush3.bf16.msra.mxu0 %v1262_v22  ;;  %v1304_v17 = vld [vmem:[%s1678_s1 + $0x1b8] sm:$0xff]  }
  0x19   :  { %1123 = vmatpush3.bf16.msra.mxu1 %v1263_v23  ;;  %1102 = vmatprep.subr.bf16.mxu0 %v1264_v24 }
  0x1a   :  { %1124 = vmatprep.subr.bf16.mxu1 %v1265_v25 }
  0x1c   :  { %1103 = vmatpush3.bf16.msra.mxu0 %v1266_v26 }
  0x1d   :  { %1125 = vmatpush3.bf16.msra.mxu1 %v1267_v27  ;;  %1104 = vmatprep.subr.bf16.mxu0 %v1268_v29 }
  0x1e   :  { %1126 = vmatprep.subr.bf16.mxu1 %v1269_v30 }
  0x20   :  { %1105 = vmatpush3.bf16.msra.mxu0 %v1270_v31 }
  0x21   :  { %1127 = vmatpush3.bf16.msra.mxu1 %v1271_v32  ;;  %1134 = vmatprep.subr.bf16.mxu0 %v1273_v35 }
  0x22   :  { %1156 = vmatprep.subr.bf16.mxu1 %v1274_v38 }
  0x23   :  { %635 = vmatmul.mubr.bf16.vlgmr.msra.gmra.mrb[0].mxu0 %v184_v45 }
  0x24   :  { %1135 = vmatpush3.bf16.msra.mxu0 %v1275_v47  ;;  %675 = vmatmul.mubr.bf16.vlgmr.msra.gmra.mrb[0].mxu1 %v206_v51 }
  0x25   :  { %1136 = vmatprep.subr.bf16.mxu0 %v1277_v52  ;;  %1157 = vmatpush3.bf16.msra.mxu1 %v1276_v49 }
  0x26   :  { %714 = vmatprep.mubr.bf16.mxu0 %v205_v50  ;;  %1158 = vmatprep.subr.bf16.mxu1 %v1278_v54 }
  0x27   :  { %754 = vmatprep.mubr.bf16.mxu1 %v209_v56 }
  0x28   :  { %1137 = vmatpush3.bf16.msra.mxu0 %v1279_v55 }
  0x29   :  { %1138 = vmatprep.subr.bf16.mxu0 %v1281_v58  ;;  %1159 = vmatpush3.bf16.msra.mxu1 %v1280_v57 }
  0x2a   :  { %1160 = vmatprep.subr.bf16.mxu1 %v1282_v59 }
  0x2c   :  { %1139 = vmatpush3.bf16.msra.mxu0 %v1283_v60 }
  0x2d   :  { %1140 = vmatprep.subr.bf16.mxu0 %v1285_v62  ;;  %1161 = vmatpush3.bf16.msra.mxu1 %v1284_v61 }
  0x2e   :  { %1162 = vmatprep.subr.bf16.mxu1 %v1286_v63 }
  0x30   :  { %1141 = vmatpush3.bf16.msra.mxu0 %v1287_v0 }
  0x31   :  { %1142 = vmatprep.subr.bf16.mxu0 %v1289_v2  ;;  %1163 = vmatpush3.bf16.msra.mxu1 %v1288_v1 }
  0x32   :  { %1164 = vmatprep.subr.bf16.mxu1 %v1290_v3 }
  0x34   :  { %1143 = vmatpush3.bf16.msra.mxu0 %v1291_v4 }
  0x35   :  { %1144 = vmatprep.subr.bf16.mxu0 %v1293_v6  ;;  %1165 = vmatpush3.bf16.msra.mxu1 %v1292_v5 }
  0x36   :  { %1166 = vmatprep.subr.bf16.mxu1 %v1294_v7 }
  0x38   :  { %1145 = vmatpush3.bf16.msra.mxu0 %v1295_v8 }
  0x39   :  { %1146 = vmatprep.subr.bf16.mxu0 %v1297_v10  ;;  %1167 = vmatpush3.bf16.msra.mxu1 %v1296_v9 }
  0x3a   :  { %1168 = vmatprep.subr.bf16.mxu1 %v1298_v11 }
  0x3c   :  { %1147 = vmatpush3.bf16.msra.mxu0 %v1299_v12 }
  0x3d   :  { %1148 = vmatprep.subr.bf16.mxu0 %v1301_v13  ;;  %1169 = vmatpush3.bf16.msra.mxu1 %v1300_v14 }
  0x3e   :  { %1170 = vmatprep.subr.bf16.mxu1 %v1302_v15 }
  0x40   :  { %1149 = vmatpush3.bf16.msra.mxu0 %v1303_v16 }
  0x41   :  { %11 = vsyncpa [#allocation4], 0  ;;  %v207_v19 = vcombine.high %v191_v18, %v191_v18  ;;  %1171 = vmatpush3.bf16.msra.mxu1 %v1304_v17  ;;  %v1305_v20 = vld [vmem:[%s1679_s2] sm:$0xff]   ;;  %v1346_v21 = vmov 0.0   ;;  %v1306_v22 = vld [vmem:[%s1679_s2 + $0x8] sm:$0xff]   ;;  %vm1347_vm0 = vmmov 0  }
  0x42   :  { %1196 = vmatprep.subr.bf16.mxu0 %v1346_v21  ;;  %29 = vst [vmem:[#allocation2] sm:$0x3] %v1346_v21  ;;  %1216 = vmatprep.subr.bf16.mxu1 %v1346_v21  ;;  %v1307_v23 = vld [vmem:[%s1679_s2 + $0x10] sm:$0xff]   ;;  %v1308_v24 = vld [vmem:[%s1679_s2 + $0x18] sm:$0xff]   ;;  %v1309_v25 = vld [vmem:[%s1679_s2 + $0x20] sm:$0xff]   ;;  %s1348_s12 = smov [#allocation3]  }
  0x43   :  { %715 = vmatmul.mubr.bf16.vlgmr.msra.gmra.mrb[4].mxu0 %v191_v18  ;;  %v1310_v26 = vld [vmem:[%s1679_s2 + $0x28] sm:$0xff]   ;;  %v1311_v27 = vld [vmem:[%s1679_s2 + $0x30] sm:$0xff]   ;;  %v1312_v28 = vld [vmem:[%s1679_s2 + $0x38] sm:$0xff]   ;;  %s1000_s13 = sshll.u32 %s1348_s12, 4  ;;  %s1001_s13 = int_to_ptr.vmem [resolvable:$true] %s1000_s13 }
  0x44   :  { %755 = vmatmul.mubr.bf16.vlgmr.msra.gmra.mrb[4].mxu1 %v207_v19  ;;  %1197 = vmatpush3.bf16.msra.mxu0 %v1305_v20  ;;  %v1313_v29 = vld [vmem:[%s1681_s4] sm:$0xff]   ;;  %v1314_v30 = vld [vmem:[%s1681_s4 + $0x8] sm:$0xff]   ;;  %v1315_v31 = vld [vmem:[%s1681_s4 + $0x10] sm:$0xff]   ;;  %p1326_p1 = scmp.lt.s32.totalorder %s1001_s13, %s1001_s13 }
  0x45   :  { %1198 = vmatprep.subr.bf16.mxu0 %v1346_v21  ;;  %1212 = vmatprep.mubr.msk.bf16.mxu0 %vm1347_vm0, %v1346_v21  ;;  %v1316_v32 = vld [vmem:[%s1681_s4 + $0x18] sm:$0xff]   ;;  %v1317_v33 = vld [vmem:[%s1681_s4 + $0x20] sm:$0xff]   ;;  %v1318_v34 = vld [vmem:[%s1681_s4 + $0x28] sm:$0xff]  }
  0x46   :  { %1232 = vmatprep.mubr.msk.bf16.mxu1 %vm1347_vm0, %v1346_v21  ;;  %1217 = vmatpush3.bf16.msra.mxu1 %v1313_v29  ;;  %v1319_v62 = vld [vmem:[%s1681_s4 + $0x30] sm:$0xff]   ;;  %v1320_v63 = vld [vmem:[%s1681_s4 + $0x38] sm:$0xff]   ;;  %v1072_v0 = vld [vmem:[%s1680_s3] ss:$0 sm:$0xff]  ;;  %s1321_s3 = scalar_lea.vmem %s1001_s13, 32 }
  0x47   :  { %1218 = vmatprep.subr.bf16.mxu1 %v1346_v21  ;;  %v1081_v8 = vld [vmem:[%s1682_s5] ss:$0 sm:$0xff]  ;;  %p1322_p0 = scmp.ne.s32.totalorder %s1001_s13, %s1321_s3  ;;  %p1327_p2 = scmp.lt.s32.totalorder %s1321_s3, %s1321_s3 }
  0x48   :  { %1199 = vmatpush3.bf16.msra.mxu0 %v1306_v22 }
  0x49   :  { %1200 = vmatprep.subr.bf16.mxu0 %v1346_v21  ;;  %v30_v56 = vld [vmem:[#allocation2] sm:$0x3]  ;;  %p1328_p3 = por %p1327_p2, %p1326_p1 }
  0x4a   :  { %1219 = vmatpush3.bf16.msra.mxu1 %v1314_v30 }
  0x4b   :  { %1220 = vmatprep.subr.bf16.mxu1 %v1346_v21  ;;  %p1329_p4 = pnand %p1328_p3, %p1322_p0 }
  0x4c   :  { %1201 = vmatpush3.bf16.msra.mxu0 %v1307_v23 }
  0x4d   :  { %1202 = vmatprep.subr.bf16.mxu0 %v1346_v21 }
  0x4e   :  { %1221 = vmatpush3.bf16.msra.mxu1 %v1315_v31 }
  0x4f   :  { %1222 = vmatprep.subr.bf16.mxu1 %v1346_v21 }
  0x50   :  { %1203 = vmatpush3.bf16.msra.mxu0 %v1308_v24 }
  0x51   :  { %1204 = vmatprep.subr.bf16.mxu0 %v1346_v21 }
  0x52   :  { %1223 = vmatpush3.bf16.msra.mxu1 %v1316_v32 }
  0x53   :  { %1224 = vmatprep.subr.bf16.mxu1 %v1346_v21 }
  0x54   :  { %1205 = vmatpush3.bf16.msra.mxu0 %v1309_v25 }
  0x55   :  { %1206 = vmatprep.subr.bf16.mxu0 %v1346_v21 }
  0x56   :  { %1225 = vmatpush3.bf16.msra.mxu1 %v1317_v33 }
  0x57   :  { %1226 = vmatprep.subr.bf16.mxu1 %v1346_v21 }
  0x58   :  { %1207 = vmatpush3.bf16.msra.mxu0 %v1310_v26 }
  0x59   :  { %1208 = vmatprep.subr.bf16.mxu0 %v1346_v21 }
  0x5a   :  { %1227 = vmatpush3.bf16.msra.mxu1 %v1318_v34 }
  0x5b   :  { %1228 = vmatprep.subr.bf16.mxu1 %v1346_v21 }
  0x5c   :  { %1209 = vmatpush3.bf16.msra.mxu0 %v1311_v27 }
  0x5d   :  { %1210 = vmatprep.subr.bf16.mxu0 %v1346_v21 }
  0x5e   :  { %1229 = vmatpush3.bf16.msra.mxu1 %v1319_v62 }
  0x5f   :  { %1230 = vmatprep.subr.bf16.mxu1 %v1346_v21 }
  0x60   :  { %1211 = vmatpush3.bf16.msra.mxu0 %v1312_v28 }
  0x62   :  { %1231 = vmatpush3.bf16.msra.mxu1 %v1320_v63 }
  0xf6   :  { %v1106_v35 = vpop.f32.mrb[0].mxu0 }
  0xf7   :  { %v1107_v36 = vpop.f32.mrb[1].mxu0  ;;  %v1128_v37 = vpop.f32.mrb[0].mxu1 }
  0xf8   :  { %v1108_v38 = vadd.f32 %v1107_v36, %v1106_v35  ;;  %v1109_v39 = vpop.f32.mrb[2].mxu0  ;;  %v1129_v40 = vpop.f32.mrb[1].mxu1 }
  0xf9   :  { %v1110_v41 = vpop.f32.mrb[3].mxu0  ;;  %v1130_v42 = vadd.f32 %v1129_v40, %v1128_v37  ;;  %v1131_v43 = vpop.f32.mrb[2].mxu1 }
  0xfa   :  { %v1132_v44 = vpop.f32.mrb[3].mxu1 }
  0xfb   :  { %v677_v45 = vadd.f32 %v1130_v42, %v1108_v38 }
 0x116   :  { %v1150_v46 = vpop.f32.mrb[4].mxu0 }
 0x117   :  { %v1151_v47 = vpop.f32.mrb[5].mxu0  ;;  %v1172_v48 = vpop.f32.mrb[4].mxu1 }
 0x118   :  { %v1152_v49 = vadd.f32 %v1151_v47, %v1150_v46  ;;  %v1153_v50 = vpop.f32.mrb[6].mxu0  ;;  %v1173_v51 = vpop.f32.mrb[5].mxu1 }
 0x119   :  { %v1154_v52 = vpop.f32.mrb[7].mxu0  ;;  %v1174_v54 = vadd.f32 %v1173_v51, %v1172_v48  ;;  %v1175_v55 = vpop.f32.mrb[6].mxu1 }
 0x11a   :  { %v717_v53 = vadd.f32 %v1152_v49, %v677_v45  ;;  %v1176_v57 = vpop.f32.mrb[7].mxu1 }
 0x11c   :  { %v757_v58 = vadd.f32 %v1174_v54, %v717_v53 }
 0x11e   :  { %v762_v59 = vadd.f32 %v757_v58, %v30_v56 }
 0x120   :  { %763 = vst [vmem:[#allocation2] sm:$0x3] %v762_v59 }
 0x127   :  { %v767_v60 = vld [vmem:[#allocation2] sm:$0x3] }
 0x128   :  { %v768_v61 = vpack.c.bf16 %v767_v60, %v767_v60 }
 0x12a   :  { %1213 = vmatmul.mubr.bf16.vlgmr.msra.gmra.mrb[8].mxu0 %v768_v61 }
 0x1fd   :  { %v874_v1 = vpop.f32.mrb[8].mxu0 }
 0x1fe   :  { %v875_v2 = vadd.f32 %v1072_v0, %v874_v1  ;;  %v1214_v3 = vpop.f32.mrb[9].mxu0 }
 0x1ff   :  { %v877_v4 = vpop.f32.mrb[10].mxu0 }
 0x200   :  { %v880_v5 = vmax.f32 %v875_v2, 0.0  ;;  %v1215_v6 = vpop.f32.mrb[11].mxu0 }
 0x202   :  { %v881_v7 = vpack.c.bf16 %v880_v5, %v880_v5 }
 0x204   :  { %1233 = vmatmul.mubr.bf16.vlgmr.msra.gmra.mrb[8].mxu1 %v881_v7 }
 0x2d7   :  { %v987_v9 = vpop.f32.mrb[8].mxu1 }
 0x2d8   :  { %v988_v10 = vadd.f32 %v1081_v8, %v987_v9  ;;  %v1234_v11 = vpop.f32.mrb[9].mxu1 }
 0x2d9   :  { %v990_v12 = vpop.f32.mrb[10].mxu1 }
 0x2da   :  { %993 = vst [vmem:[#allocation3] sm:$0x3] %v988_v10  ;;  %v1235_v13 = vpop.f32.mrb[11].mxu1 }
 0x2db   :  { %1332 = shalt.err (!%p1329_p4)
}
 0x2dc   :  { %s1333_s5 = scalar_lea.hbm %s1683_s6, 32 }
 0x2dd   :  { %p1334_p5 = scmp.ne.s32.totalorder %s1683_s6, %s1333_s5  ;;  %p1337_p6 = scmp.lt.u32.totalorder %s1333_s5, %s1683_s6 }
 0x2df   :  { %p1339_p7 = pnand %p1337_p6, %p1334_p5 }
 0x2e1   :  { %1342 = shalt.err (!%p1339_p7)
}
 0x2e2   :  { %1003 = dma.vmem_to_hbm [thread:$0]  %s1001_s13, 32, %s1683_s6, [#allocation4]  }
 0x2e3   :  { %1343 = dma.done.wait [#allocation4], 32  }
 0x2e4   :  { %1344 = vsyncadd [#allocation4], 4294967264 }
 0x2e5   :  { %1007 = vsyncpa [#allocation4], 1 }

</bundles_post_ra>
